<compile_context>
chip_gen: v6e
topology: v6e:2x2x1
jax: 0.10.0
libtpu: 0.0.40
codegen_flags: <defaults>
</compile_context>

<pallas_src>
import math

import jax
import jax.numpy as jnp
from jax import lax
from jax.experimental import pallas as pl
from jax.experimental.pallas import tpu as pltpu


# Flip to True for bf16 MXU operands with f32 accumulation (faster, ~1e-3 err).
_USE_BF16_MATMUL = False


# ---------------------------------------------------------------------------
# Kernel: one band of Tp ORIGINAL rows -> 2*Tp output rows
# ---------------------------------------------------------------------------
def _make_upsample_kernel(Tp, W2, Ci, Co, flat_out):
    """Refs per grid step:
      xw_ref : (Ci, Tp+2, W2+2) width-upsampled, zero-padded band
      w_ref  : (2*Co, 9*Ci)     row-parity-stacked tap weights
      b_ref  : (2*Co, 1)        bias (repeated for both row parities)
      o_ref  : (Co, 2*Tp*W2) if flat_out else (Co, 2*Tp, W2)
      rhs_ref: (2, 9*Ci, W2)    double-buffered im2col scratch
    """

    def kernel(xw_ref, w_ref, b_ref, o_ref, rhs_ref):
        wmat = w_ref[...]                                   # stays resident
        bias = jnp.broadcast_to(b_ref[...], (2 * Co, W2))   # hoisted once

        # Rolling 3-row window over the band: each band row is loaded once.
        r_lo = xw_ref[:, 0, :]
        r_mid = xw_ref[:, 1, :]
        for t in range(Tp):                                  # full unroll
            r_hi = xw_ref[:, t + 2, :]
            rows3 = (r_lo, r_mid, r_hi)
            slot = t % 2
            # im2col scratch: K ordered as (row tap r, col tap dx, channel c)
            for r in range(3):
                for dx in range(3):
                    k0 = (r * 3 + dx) * Ci
                    rhs_ref[slot, k0:k0 + Ci, :] = rows3[r][:, dx:dx + W2]
            # One MXU push per original row: (2Co, 9Ci) @ (9Ci, W2)
            res = jnp.dot(wmat, rhs_ref[slot],
                          preferred_element_type=jnp.float32)
            res = (res + bias).astype(o_ref.dtype)           # (2Co, W2)
            if flat_out:
                o_ref[:, (2 * t) * W2:(2 * t + 1) * W2] = res[:Co, :]
                o_ref[:, (2 * t + 1) * W2:(2 * t + 2) * W2] = res[Co:, :]
            else:
                o_ref[:, 2 * t, :] = res[:Co, :]
                o_ref[:, 2 * t + 1, :] = res[Co:, :]
            r_lo, r_mid = r_mid, r_hi

    return kernel


# ---------------------------------------------------------------------------
# Band-size selection (original rows per band)
# ---------------------------------------------------------------------------
def _pick_tp(H, W, N, Ci, Co):
    W2 = 2 * W

    def vmem_need(t):
        blk_in = Ci * (t + 2) * (W2 + 2)
        blk_out = Co * 2 * t * W2
        return 4 * (2 * (blk_in + blk_out) + 2 * Co * 9 * Ci + 2 * 9 * Ci * W2)

    if H <= 8:
        return H, 1
    cands = [t for t in (32, 16, 8) if t < 2 * H and vmem_need(t) <= 24 * 2 ** 20]
    if not cands:
        cands = [8]
    tp = cands[0]
    for t in cands:                      # biggest band with >=4 grid steps
        if N * (-(-H // t)) >= 4:        # (v7x: keep both TensorCores busy)
            tp = t
            break
    return tp, -(-H // tp)


# ---------------------------------------------------------------------------
# Wrapper: nearest-2x upsample + 3x3 SAME conv, NCHW in / NCHW out
# ---------------------------------------------------------------------------
@jax.jit
def upsample_conv2d(x, weight, bias):
    N, Ci, H, W = x.shape
    Co = weight.shape[0]
    W2, Wp2 = 2 * W, 2 * W + 2

    Tp, nb = _pick_tp(H, W, N, Ci, Co)
    Hpad = Tp * nb
    flat_out = (nb == 1) or ((2 * Tp * W2) % 128 == 0)

    cdt = jnp.bfloat16 if _USE_BF16_MATMUL else x.dtype

    # ---- width-only nearest upsample + zero pad + banding (fused XLA pass).
    # Height upsampling is folded into the weights, so the 4x-larger upsampled
    # image never hits HBM.
    xw = jnp.broadcast_to(
        x[:, :, :, :, None], (N, Ci, H, W, 2)
    ).reshape(N, Ci, H, W2)
    xwp = jnp.pad(xw, ((0, 0), (0, 0), (1, 1 + Hpad - H), (1, 1))).astype(cdt)
    xbands = jnp.stack(
        [xwp[:, :, k * Tp:k * Tp + Tp + 2, :] for k in range(nb)], axis=2
    )                                                  # (N, Ci, nb, Tp+2, Wp2)

    # ---- fold the height upsampling into the tap weights:
    # y[o, 2t+a, j] = sum_{r,dx,c} G[a, r, o, c, dx] * xwp[c, t+r, j+dx] + b[o]
    w = weight                                          # (Co, Ci, 3, 3)
    G = jnp.zeros((2, 3, Co, Ci, 3), jnp.float32)       # [a, r, o, c, dx]
    G = G.at[0, 0].set(w[:, :, 0, :])
    G = G.at[0, 1].set(w[:, :, 1, :] + w[:, :, 2, :])
    G = G.at[1, 1].set(w[:, :, 0, :] + w[:, :, 1, :])
    G = G.at[1, 2].set(w[:, :, 2, :])
    wstack = jnp.transpose(G, (0, 2, 1, 4, 3)).reshape(2 * Co, 9 * Ci).astype(cdt)
    b2 = jnp.concatenate([bias, bias]).reshape(2 * Co, 1).astype(jnp.float32)

    if flat_out:
        out_shape = jax.ShapeDtypeStruct((N, Co, 2 * Hpad * W2), x.dtype)
        out_spec = pl.BlockSpec((None, Co, 2 * Tp * W2), lambda n, k: (n, 0, k))
    else:
        out_shape = jax.ShapeDtypeStruct((N, Co, 2 * Hpad, W2), x.dtype)
        out_spec = pl.BlockSpec((None, Co, 2 * Tp, W2), lambda n, k: (n, 0, k, 0))

    vmem_need = 4 * (2 * (Ci * (Tp + 2) * Wp2 + Co * 2 * Tp * W2)
                     + 2 * Co * 9 * Ci + 2 * 9 * Ci * W2)
    vmem_limit = int(min(max(vmem_need + (8 << 20), 32 << 20), 56 << 20))

    out = pl.pallas_call(
        _make_upsample_kernel(Tp, W2, Ci, Co, flat_out),
        out_shape=out_shape,
        grid_spec=pltpu.PrefetchScalarGridSpec(
            num_scalar_prefetch=0,
            grid=(N, nb),
            in_specs=[
                pl.BlockSpec((None, Ci, None, Tp + 2, Wp2),
                             lambda n, k: (n, 0, k, 0, 0)),
                pl.BlockSpec((2 * Co, 9 * Ci), lambda n, k: (0, 0)),
                pl.BlockSpec((2 * Co, 1), lambda n, k: (0, 0)),
            ],
            out_specs=out_spec,
            scratch_shapes=[pltpu.VMEM((2, 9 * Ci, W2), cdt)],
        ),
        compiler_params=pltpu.CompilerParams(
            dimension_semantics=("parallel", "parallel"),
            vmem_limit_bytes=vmem_limit,
        ),
        cost_estimate=pl.CostEstimate(
            flops=2 * N * Hpad * (2 * Co) * (9 * Ci) * W2,
            transcendentals=0,
            bytes_accessed=(xbands.size * xbands.dtype.itemsize
                            + wstack.size * wstack.dtype.itemsize
                            + b2.size * 4
                            + N * Co * 2 * Hpad * W2 * x.dtype.itemsize),
        ),
    )(xbands, wstack, b2)

    y = out.reshape(N, Co, 2 * Hpad, W2) if flat_out else out
    if Hpad != H:
        y = y[:, :, :2 * H, :]
    return y


# ---------------------------------------------------------------------------
# Module: UpSample
# ---------------------------------------------------------------------------
class UpSample:
    def __init__(self, in_ch, key):
        self.in_ch = in_ch
        # nn.Conv2d(in_ch, in_ch, 3, stride=1, padding=1), xavier_uniform_, zero bias
        fan_in = in_ch * 3 * 3
        fan_out = in_ch * 3 * 3
        limit = math.sqrt(6.0 / (fan_in + fan_out))
        self.weight = jax.random.uniform(
            key, (in_ch, in_ch, 3, 3), jnp.float32, minval=-limit, maxval=limit
        )
        self.bias = jnp.zeros((in_ch,), jnp.float32)

    def __call__(self, x, temb=None, c_cemb=None, s_cemb=None):
        # temb / c_cemb / s_cemb are unused, as in the reference module.
        return upsample_conv2d(x, self.weight, self.bias)


# ---------------------------------------------------------------------------
if __name__ == "__main__":
    def ref(xin, w, b):
        xu = jnp.repeat(jnp.repeat(xin, 2, axis=2), 2, axis=3)
        out = lax.conv_general_dilated(
            xu, w, window_strides=(1, 1), padding="SAME",
            dimension_numbers=("NCHW", "OIHW", "NCHW"),
        )
        return out + b.reshape(1, -1, 1, 1)

    key = jax.random.PRNGKey(0)
    k_w, k_x = jax.random.split(key)

    # Main case: multi-band, lane-dense (flattened) output path.
    N, C, H, W = 2, 4, 16, 16
    x = jax.random.normal(k_x, (N, C, H, W), jnp.float32)
    mod = UpSample(C, k_w)
    y = jax.block_until_ready(mod(x, None, None, None))
    assert y.shape == (N, C, 2 * H, 2 * W), y.shape
    y_ref = ref(x, mod.weight, mod.bias)
    assert jnp.allclose(y, y_ref, atol=1e-4, rtol=1e-4), float(
        jnp.max(jnp.abs(y - y_ref)))

    # Small / odd spatial size: single-band path.
    x2 = jax.random.normal(jax.random.PRNGKey(1), (1, 3, 6, 5), jnp.float32)
    mod2 = UpSample(3, jax.random.PRNGKey(2))
    y2 = jax.block_until_ready(mod2(x2, None, None, None))
    assert y2.shape == (1, 3, 12, 10), y2.shape
    y2_ref = ref(x2, mod2.weight, mod2.bias)
    assert jnp.allclose(y2, y2_ref, atol=1e-4, rtol=1e-4), float(
        jnp.max(jnp.abs(y2 - y2_ref)))

    # Odd width + several bands: non-flattened output path.
    x3 = jax.random.normal(jax.random.PRNGKey(3), (1, 8, 32, 5), jnp.float32)
    mod3 = UpSample(8, jax.random.PRNGKey(4))
    y3 = jax.block_until_ready(mod3(x3, None, None, None))
    assert y3.shape == (1, 8, 64, 10), y3.shape
    y3_ref = ref(x3, mod3.weight, mod3.bias)
    assert jnp.allclose(y3, y3_ref, atol=1e-4, rtol=1e-4), float(
        jnp.max(jnp.abs(y3 - y3_ref)))

    print("KERNEL_OK")
</pallas_src>

<mosaic_0001>
module attributes {stable_mosaic.version = 11 : i64} {
  func.func @kernel(%arg0: i32, %arg1: i32, %arg2: memref<1x4x1x10x34xf32, #tpu.memory_space<vmem>>, %arg3: memref<8x36xf32, #tpu.memory_space<vmem>>, %arg4: memref<8x1xf32, #tpu.memory_space<vmem>>, %arg5: memref<1x4x512xf32, #tpu.memory_space<vmem>>, %arg6: memref<2x36x32xf32, #tpu.memory_space<vmem>>) attributes {dimension_semantics = [#tpu.dimension_semantics<parallel>, #tpu.dimension_semantics<parallel>], iteration_bounds = array<i64: 2, 2>, scalar_prefetch = 0 : i64, scratch_operands = 1 : i64, tpu.core_type = #tpu.core_type<tc>, window_params = [{transform_indices = @transform_0, window_bounds = array<i64: 1, 4, 1, 10, 34>}, {pipeline_mode = #tpu.pipeline_mode<synchronous>, transform_indices = @transform_1, window_bounds = array<i64: 8, 36>}, {pipeline_mode = #tpu.pipeline_mode<synchronous>, transform_indices = @transform_2, window_bounds = array<i64: 8, 1>}, {transform_indices = @transform_3, window_bounds = array<i64: 1, 4, 512>}]} {
    %c0 = arith.constant 0 : index
    %c0_0 = arith.constant 0 : index
    %0 = vector.load %arg3[%c0, %c0_0] : memref<8x36xf32, #tpu.memory_space<vmem>>, vector<8x36xf32>
    %c0_1 = arith.constant 0 : index
    %c0_2 = arith.constant 0 : index
    %1 = vector.load %arg4[%c0_1, %c0_2] : memref<8x1xf32, #tpu.memory_space<vmem>>, vector<8x1xf32>
    %2 = vector.shape_cast %1 : vector<8x1xf32> to vector<8x1xf32>
    %3 = vector.broadcast %2 : vector<8x1xf32> to vector<8x32xf32>
    %c0_3 = arith.constant 0 : index
    %c0_4 = arith.constant 0 : index
    %c0_5 = arith.constant 0 : index
    %c0_6 = arith.constant 0 : index
    %c0_7 = arith.constant 0 : index
    %4 = vector.load %arg2[%c0_3, %c0_4, %c0_5, %c0_6, %c0_7] : memref<1x4x1x10x34xf32, #tpu.memory_space<vmem>>, vector<1x4x1x1x34xf32>
    %5 = vector.shape_cast %4 : vector<1x4x1x1x34xf32> to vector<4x34xf32>
    %c0_8 = arith.constant 0 : index
    %c0_9 = arith.constant 0 : index
    %c0_10 = arith.constant 0 : index
    %c1 = arith.constant 1 : index
    %c0_11 = arith.constant 0 : index
    %6 = vector.load %arg2[%c0_8, %c0_9, %c0_10, %c1, %c0_11] : memref<1x4x1x10x34xf32, #tpu.memory_space<vmem>>, vector<1x4x1x1x34xf32>
    %7 = vector.shape_cast %6 : vector<1x4x1x1x34xf32> to vector<4x34xf32>
    %c0_12 = arith.constant 0 : index
    %c0_13 = arith.constant 0 : index
    %c0_14 = arith.constant 0 : index
    %c2 = arith.constant 2 : index
    %c0_15 = arith.constant 0 : index
    %8 = vector.load %arg2[%c0_12, %c0_13, %c0_14, %c2, %c0_15] : memref<1x4x1x10x34xf32, #tpu.memory_space<vmem>>, vector<1x4x1x1x34xf32>
    %9 = vector.shape_cast %8 : vector<1x4x1x1x34xf32> to vector<4x34xf32>
    %10 = vector.extract_strided_slice %5 {offsets = [0, 0], sizes = [4, 32], strides = [1, 1]} : vector<4x34xf32> to vector<4x32xf32>
    %c0_16 = arith.constant 0 : index
    %c0_17 = arith.constant 0 : index
    %c0_18 = arith.constant 0 : index
    %11 = vector.load %arg6[%c0_16, %c0_17, %c0_18] : memref<2x36x32xf32, #tpu.memory_space<vmem>>, vector<1x4x32xf32>
    %12 = vector.shape_cast %11 : vector<1x4x32xf32> to vector<4x32xf32>
    %13 = vector.shape_cast %10 : vector<4x32xf32> to vector<1x4x32xf32>
    tpu.vector_store %arg6[%c0_16, %c0_17, %c0_18], %13 {strides = array<i32>} : memref<2x36x32xf32, #tpu.memory_space<vmem>>, vector<1x4x32xf32>,
    %14 = vector.extract_strided_slice %5 {offsets = [0, 1], sizes = [4, 32], strides = [1, 1]} : vector<4x34xf32> to vector<4x32xf32>
    %c0_19 = arith.constant 0 : index
    %c4 = arith.constant 4 : index
    %c0_20 = arith.constant 0 : index
    %15 = vector.load %arg6[%c0_19, %c4, %c0_20] : memref<2x36x32xf32, #tpu.memory_space<vmem>>, vector<1x4x32xf32>
    %16 = vector.shape_cast %15 : vector<1x4x32xf32> to vector<4x32xf32>
    %17 = vector.shape_cast %14 : vector<4x32xf32> to vector<1x4x32xf32>
    tpu.vector_store %arg6[%c0_19, %c4, %c0_20], %17 {strides = array<i32>} : memref<2x36x32xf32, #tpu.memory_space<vmem>>, vector<1x4x32xf32>,
    %18 = vector.extract_strided_slice %5 {offsets = [0, 2], sizes = [4, 32], strides = [1, 1]} : vector<4x34xf32> to vector<4x32xf32>
    %c0_21 = arith.constant 0 : index
    %c8 = arith.constant 8 : index
    %c0_22 = arith.constant 0 : index
    %19 = vector.load %arg6[%c0_21, %c8, %c0_22] : memref<2x36x32xf32, #tpu.memory_space<vmem>>, vector<1x4x32xf32>
    %20 = vector.shape_cast %19 : vector<1x4x32xf32> to vector<4x32xf32>
    %21 = vector.shape_cast %18 : vector<4x32xf32> to vector<1x4x32xf32>
    tpu.vector_store %arg6[%c0_21, %c8, %c0_22], %21 {strides = array<i32>} : memref<2x36x32xf32, #tpu.memory_space<vmem>>, vector<1x4x32xf32>,
    %22 = vector.extract_strided_slice %7 {offsets = [0, 0], sizes = [4, 32], strides = [1, 1]} : vector<4x34xf32> to vector<4x32xf32>
    %c0_23 = arith.constant 0 : index
    %c12 = arith.constant 12 : index
    %c0_24 = arith.constant 0 : index
    %23 = vector.load %arg6[%c0_23, %c12, %c0_24] : memref<2x36x32xf32, #tpu.memory_space<vmem>>, vector<1x4x32xf32>
    %24 = vector.shape_cast %23 : vector<1x4x32xf32> to vector<4x32xf32>
    %25 = vector.shape_cast %22 : vector<4x32xf32> to vector<1x4x32xf32>
    tpu.vector_store %arg6[%c0_23, %c12, %c0_24], %25 {strides = array<i32>} : memref<2x36x32xf32, #tpu.memory_space<vmem>>, vector<1x4x32xf32>,
    %26 = vector.extract_strided_slice %7 {offsets = [0, 1], sizes = [4, 32], strides = [1, 1]} : vector<4x34xf32> to vector<4x32xf32>
    %c0_25 = arith.constant 0 : index
    %c16 = arith.constant 16 : index
    %c0_26 = arith.constant 0 : index
    %27 = vector.load %arg6[%c0_25, %c16, %c0_26] : memref<2x36x32xf32, #tpu.memory_space<vmem>>, vector<1x4x32xf32>
    %28 = vector.shape_cast %27 : vector<1x4x32xf32> to vector<4x32xf32>
    %29 = vector.shape_cast %26 : vector<4x32xf32> to vector<1x4x32xf32>
    tpu.vector_store %arg6[%c0_25, %c16, %c0_26], %29 {strides = array<i32>} : memref<2x36x32xf32, #tpu.memory_space<vmem>>, vector<1x4x32xf32>,
    %30 = vector.extract_strided_slice %7 {offsets = [0, 2], sizes = [4, 32], strides = [1, 1]} : vector<4x34xf32> to vector<4x32xf32>
    %c0_27 = arith.constant 0 : index
    %c20 = arith.constant 20 : index
    %c0_28 = arith.constant 0 : index
    %31 = vector.load %arg6[%c0_27, %c20, %c0_28] : memref<2x36x32xf32, #tpu.memory_space<vmem>>, vector<1x4x32xf32>
    %32 = vector.shape_cast %31 : vector<1x4x32xf32> to vector<4x32xf32>
    %33 = vector.shape_cast %30 : vector<4x32xf32> to vector<1x4x32xf32>
    tpu.vector_store %arg6[%c0_27, %c20, %c0_28], %33 {strides = array<i32>} : memref<2x36x32xf32, #tpu.memory_space<vmem>>, vector<1x4x32xf32>,
    %34 = vector.extract_strided_slice %9 {offsets = [0, 0], sizes = [4, 32], strides = [1, 1]} : vector<4x34xf32> to vector<4x32xf32>
    %c0_29 = arith.constant 0 : index
    %c24 = arith.constant 24 : index
    %c0_30 = arith.constant 0 : index
    %35 = vector.load %arg6[%c0_29, %c24, %c0_30] : memref<2x36x32xf32, #tpu.memory_space<vmem>>, vector<1x4x32xf32>
    %36 = vector.shape_cast %35 : vector<1x4x32xf32> to vector<4x32xf32>
    %37 = vector.shape_cast %34 : vector<4x32xf32> to vector<1x4x32xf32>
    tpu.vector_store %arg6[%c0_29, %c24, %c0_30], %37 {strides = array<i32>} : memref<2x36x32xf32, #tpu.memory_space<vmem>>, vector<1x4x32xf32>,
    %38 = vector.extract_strided_slice %9 {offsets = [0, 1], sizes = [4, 32], strides = [1, 1]} : vector<4x34xf32> to vector<4x32xf32>
    %c0_31 = arith.constant 0 : index
    %c28 = arith.constant 28 : index
    %c0_32 = arith.constant 0 : index
    %39 = vector.load %arg6[%c0_31, %c28, %c0_32] : memref<2x36x32xf32, #tpu.memory_space<vmem>>, vector<1x4x32xf32>
    %40 = vector.shape_cast %39 : vector<1x4x32xf32> to vector<4x32xf32>
    %41 = vector.shape_cast %38 : vector<4x32xf32> to vector<1x4x32xf32>
    tpu.vector_store %arg6[%c0_31, %c28, %c0_32], %41 {strides = array<i32>} : memref<2x36x32xf32, #tpu.memory_space<vmem>>, vector<1x4x32xf32>,
    %42 = vector.extract_strided_slice %9 {offsets = [0, 2], sizes = [4, 32], strides = [1, 1]} : vector<4x34xf32> to vector<4x32xf32>
    %c0_33 = arith.constant 0 : index
    %c32 = arith.constant 32 : index
    %c0_34 = arith.constant 0 : index
    %43 = vector.load %arg6[%c0_33, %c32, %c0_34] : memref<2x36x32xf32, #tpu.memory_space<vmem>>, vector<1x4x32xf32>
    %44 = vector.shape_cast %43 : vector<1x4x32xf32> to vector<4x32xf32>
    %45 = vector.shape_cast %42 : vector<4x32xf32> to vector<1x4x32xf32>
    tpu.vector_store %arg6[%c0_33, %c32, %c0_34], %45 {strides = array<i32>} : memref<2x36x32xf32, #tpu.memory_space<vmem>>, vector<1x4x32xf32>,
    %c0_35 = arith.constant 0 : index
    %c0_36 = arith.constant 0 : index
    %c0_37 = arith.constant 0 : index
    %46 = vector.load %arg6[%c0_35, %c0_36, %c0_37] : memref<2x36x32xf32, #tpu.memory_space<vmem>>, vector<1x36x32xf32>
    %47 = vector.shape_cast %46 : vector<1x36x32xf32> to vector<36x32xf32>
    %cst = arith.constant dense<0.000000e+00> : vector<8x32xf32>
    %48 = tpu.matmul %0, %47, %cst {dimension_numbers = #tpu.dot_dimension_numbers<[1], [0], [0], [1], [0, 0, 1, 1], [], []>} : vector<8x36xf32>, vector<36x32xf32>, vector<8x32xf32> -> vector<8x32xf32>
    %49 = arith.addf %48, %3 : vector<8x32xf32>
    %50 = vector.extract_strided_slice %49 {offsets = [0, 0], sizes = [4, 32], strides = [1, 1]} : vector<8x32xf32> to vector<4x32xf32>
    %c0_38 = arith.constant 0 : index
    %c0_39 = arith.constant 0 : index
    %c0_40 = arith.constant 0 : index
    %51 = vector.load %arg5[%c0_38, %c0_39, %c0_40] : memref<1x4x512xf32, #tpu.memory_space<vmem>>, vector<1x4x32xf32>
    %52 = vector.shape_cast %51 : vector<1x4x32xf32> to vector<4x32xf32>
    %53 = vector.shape_cast %50 : vector<4x32xf32> to vector<1x4x32xf32>
    tpu.vector_store %arg5[%c0_38, %c0_39, %c0_40], %53 {strides = array<i32>} : memref<1x4x512xf32, #tpu.memory_space<vmem>>, vector<1x4x32xf32>,
    %54 = vector.extract_strided_slice %49 {offsets = [4, 0], sizes = [4, 32], strides = [1, 1]} : vector<8x32xf32> to vector<4x32xf32>
    %c0_41 = arith.constant 0 : index
    %c0_42 = arith.constant 0 : index
    %c32_43 = arith.constant 32 : index
    %55 = vector.load %arg5[%c0_41, %c0_42, %c32_43] : memref<1x4x512xf32, #tpu.memory_space<vmem>>, vector<1x4x32xf32>
    %56 = vector.shape_cast %55 : vector<1x4x32xf32> to vector<4x32xf32>
    %57 = vector.shape_cast %54 : vector<4x32xf32> to vector<1x4x32xf32>
    tpu.vector_store %arg5[%c0_41, %c0_42, %c32_43], %57 {strides = array<i32>} : memref<1x4x512xf32, #tpu.memory_space<vmem>>, vector<1x4x32xf32>,
    %c0_44 = arith.constant 0 : index
    %c0_45 = arith.constant 0 : index
    %c0_46 = arith.constant 0 : index
    %c3 = arith.constant 3 : index
    %c0_47 = arith.constant 0 : index
    %58 = vector.load %arg2[%c0_44, %c0_45, %c0_46, %c3, %c0_47] : memref<1x4x1x10x34xf32, #tpu.memory_space<vmem>>, vector<1x4x1x1x34xf32>
    %59 = vector.shape_cast %58 : vector<1x4x1x1x34xf32> to vector<4x34xf32>
    %60 = vector.extract_strided_slice %7 {offsets = [0, 0], sizes = [4, 32], strides = [1, 1]} : vector<4x34xf32> to vector<4x32xf32>
    %c1_48 = arith.constant 1 : index
    %c0_49 = arith.constant 0 : index
    %c0_50 = arith.constant 0 : index
    %61 = vector.load %arg6[%c1_48, %c0_49, %c0_50] : memref<2x36x32xf32, #tpu.memory_space<vmem>>, vector<1x4x32xf32>
    %62 = vector.shape_cast %61 : vector<1x4x32xf32> to vector<4x32xf32>
    %63 = vector.shape_cast %60 : vector<4x32xf32> to vector<1x4x32xf32>
    tpu.vector_store %arg6[%c1_48, %c0_49, %c0_50], %63 {strides = array<i32>} : memref<2x36x32xf32, #tpu.memory_space<vmem>>, vector<1x4x32xf32>,
    %64 = vector.extract_strided_slice %7 {offsets = [0, 1], sizes = [4, 32], strides = [1, 1]} : vector<4x34xf32> to vector<4x32xf32>
    %c1_51 = arith.constant 1 : index
    %c4_52 = arith.constant 4 : index
    %c0_53 = arith.constant 0 : index
    %65 = vector.load %arg6[%c1_51, %c4_52, %c0_53] : memref<2x36x32xf32, #tpu.memory_space<vmem>>, vector<1x4x32xf32>
    %66 = vector.shape_cast %65 : vector<1x4x32xf32> to vector<4x32xf32>
    %67 = vector.shape_cast %64 : vector<4x32xf32> to vector<1x4x32xf32>
    tpu.vector_store %arg6[%c1_51, %c4_52, %c0_53], %67 {strides = array<i32>} : memref<2x36x32xf32, #tpu.memory_space<vmem>>, vector<1x4x32xf32>,
    %68 = vector.extract_strided_slice %7 {offsets = [0, 2], sizes = [4, 32], strides = [1, 1]} : vector<4x34xf32> to vector<4x32xf32>
    %c1_54 = arith.constant 1 : index
    %c8_55 = arith.constant 8 : index
    %c0_56 = arith.constant 0 : index
    %69 = vector.load %arg6[%c1_54, %c8_55, %c0_56] : memref<2x36x32xf32, #tpu.memory_space<vmem>>, vector<1x4x32xf32>
    %70 = vector.shape_cast %69 : vector<1x4x32xf32> to vector<4x32xf32>
    %71 = vector.shape_cast %68 : vector<4x32xf32> to vector<1x4x32xf32>
    tpu.vector_store %arg6[%c1_54, %c8_55, %c0_56], %71 {strides = array<i32>} : memref<2x36x32xf32, #tpu.memory_space<vmem>>, vector<1x4x32xf32>,
    %72 = vector.extract_strided_slice %9 {offsets = [0, 0], sizes = [4, 32], strides = [1, 1]} : vector<4x34xf32> to vector<4x32xf32>
    %c1_57 = arith.constant 1 : index
    %c12_58 = arith.constant 12 : index
    %c0_59 = arith.constant 0 : index
    %73 = vector.load %arg6[%c1_57, %c12_58, %c0_59] : memref<2x36x32xf32, #tpu.memory_space<vmem>>, vector<1x4x32xf32>
    %74 = vector.shape_cast %73 : vector<1x4x32xf32> to vector<4x32xf32>
    %75 = vector.shape_cast %72 : vector<4x32xf32> to vector<1x4x32xf32>
    tpu.vector_store %arg6[%c1_57, %c12_58, %c0_59], %75 {strides = array<i32>} : memref<2x36x32xf32, #tpu.memory_space<vmem>>, vector<1x4x32xf32>,
    %76 = vector.extract_strided_slice %9 {offsets = [0, 1], sizes = [4, 32], strides = [1, 1]} : vector<4x34xf32> to vector<4x32xf32>
    %c1_60 = arith.constant 1 : index
    %c16_61 = arith.constant 16 : index
    %c0_62 = arith.constant 0 : index
    %77 = vector.load %arg6[%c1_60, %c16_61, %c0_62] : memref<2x36x32xf32, #tpu.memory_space<vmem>>, vector<1x4x32xf32>
    %78 = vector.shape_cast %77 : vector<1x4x32xf32> to vector<4x32xf32>
    %79 = vector.shape_cast %76 : vector<4x32xf32> to vector<1x4x32xf32>
    tpu.vector_store %arg6[%c1_60, %c16_61, %c0_62], %79 {strides = array<i32>} : memref<2x36x32xf32, #tpu.memory_space<vmem>>, vector<1x4x32xf32>,
    %80 = vector.extract_strided_slice %9 {offsets = [0, 2], sizes = [4, 32], strides = [1, 1]} : vector<4x34xf32> to vector<4x32xf32>
    %c1_63 = arith.constant 1 : index
    %c20_64 = arith.constant 20 : index
    %c0_65 = arith.constant 0 : index
    %81 = vector.load %arg6[%c1_63, %c20_64, %c0_65] : memref<2x36x32xf32, #tpu.memory_space<vmem>>, vector<1x4x32xf32>
    %82 = vector.shape_cast %81 : vector<1x4x32xf32> to vector<4x32xf32>
    %83 = vector.shape_cast %80 : vector<4x32xf32> to vector<1x4x32xf32>
    tpu.vector_store %arg6[%c1_63, %c20_64, %c0_65], %83 {strides = array<i32>} : memref<2x36x32xf32, #tpu.memory_space<vmem>>, vector<1x4x32xf32>,
    %84 = vector.extract_strided_slice %59 {offsets = [0, 0], sizes = [4, 32], strides = [1, 1]} : vector<4x34xf32> to vector<4x32xf32>
    %c1_66 = arith.constant 1 : index
    %c24_67 = arith.constant 24 : index
    %c0_68 = arith.constant 0 : index
    %85 = vector.load %arg6[%c1_66, %c24_67, %c0_68] : memref<2x36x32xf32, #tpu.memory_space<vmem>>, vector<1x4x32xf32>
    %86 = vector.shape_cast %85 : vector<1x4x32xf32> to vector<4x32xf32>
    %87 = vector.shape_cast %84 : vector<4x32xf32> to vector<1x4x32xf32>
    tpu.vector_store %arg6[%c1_66, %c24_67, %c0_68], %87 {strides = array<i32>} : memref<2x36x32xf32, #tpu.memory_space<vmem>>, vector<1x4x32xf32>,
    %88 = vector.extract_strided_slice %59 {offsets = [0, 1], sizes = [4, 32], strides = [1, 1]} : vector<4x34xf32> to vector<4x32xf32>
    %c1_69 = arith.constant 1 : index
    %c28_70 = arith.constant 28 : index
    %c0_71 = arith.constant 0 : index
    %89 = vector.load %arg6[%c1_69, %c28_70, %c0_71] : memref<2x36x32xf32, #tpu.memory_space<vmem>>, vector<1x4x32xf32>
    %90 = vector.shape_cast %89 : vector<1x4x32xf32> to vector<4x32xf32>
    %91 = vector.shape_cast %88 : vector<4x32xf32> to vector<1x4x32xf32>
    tpu.vector_store %arg6[%c1_69, %c28_70, %c0_71], %91 {strides = array<i32>} : memref<2x36x32xf32, #tpu.memory_space<vmem>>, vector<1x4x32xf32>,
    %92 = vector.extract_strided_slice %59 {offsets = [0, 2], sizes = [4, 32], strides = [1, 1]} : vector<4x34xf32> to vector<4x32xf32>
    %c1_72 = arith.constant 1 : index
    %c32_73 = arith.constant 32 : index
    %c0_74 = arith.constant 0 : index
    %93 = vector.load %arg6[%c1_72, %c32_73, %c0_74] : memref<2x36x32xf32, #tpu.memory_space<vmem>>, vector<1x4x32xf32>
    %94 = vector.shape_cast %93 : vector<1x4x32xf32> to vector<4x32xf32>
    %95 = vector.shape_cast %92 : vector<4x32xf32> to vector<1x4x32xf32>
    tpu.vector_store %arg6[%c1_72, %c32_73, %c0_74], %95 {strides = array<i32>} : memref<2x36x32xf32, #tpu.memory_space<vmem>>, vector<1x4x32xf32>,
    %c1_75 = arith.constant 1 : index
    %c0_76 = arith.constant 0 : index
    %c0_77 = arith.constant 0 : index
    %96 = vector.load %arg6[%c1_75, %c0_76, %c0_77] : memref<2x36x32xf32, #tpu.memory_space<vmem>>, vector<1x36x32xf32>
    %97 = vector.shape_cast %96 : vector<1x36x32xf32> to vector<36x32xf32>
    %cst_78 = arith.constant dense<0.000000e+00> : vector<8x32xf32>
    %98 = tpu.matmul %0, %97, %cst_78 {dimension_numbers = #tpu.dot_dimension_numbers<[1], [0], [0], [1], [0, 0, 1, 1], [], []>} : vector<8x36xf32>, vector<36x32xf32>, vector<8x32xf32> -> vector<8x32xf32>
    %99 = arith.addf %98, %3 : vector<8x32xf32>
    %100 = vector.extract_strided_slice %99 {offsets = [0, 0], sizes = [4, 32], strides = [1, 1]} : vector<8x32xf32> to vector<4x32xf32>
    %c0_79 = arith.constant 0 : index
    %c0_80 = arith.constant 0 : index
    %c64 = arith.constant 64 : index
    %101 = vector.load %arg5[%c0_79, %c0_80, %c64] : memref<1x4x512xf32, #tpu.memory_space<vmem>>, vector<1x4x32xf32>
    %102 = vector.shape_cast %101 : vector<1x4x32xf32> to vector<4x32xf32>
    %103 = vector.shape_cast %100 : vector<4x32xf32> to vector<1x4x32xf32>
    tpu.vector_store %arg5[%c0_79, %c0_80, %c64], %103 {strides = array<i32>} : memref<1x4x512xf32, #tpu.memory_space<vmem>>, vector<1x4x32xf32>,
    %104 = vector.extract_strided_slice %99 {offsets = [4, 0], sizes = [4, 32], strides = [1, 1]} : vector<8x32xf32> to vector<4x32xf32>
    %c0_81 = arith.constant 0 : index
    %c0_82 = arith.constant 0 : index
    %c96 = arith.constant 96 : index
    %105 = vector.load %arg5[%c0_81, %c0_82, %c96] : memref<1x4x512xf32, #tpu.memory_space<vmem>>, vector<1x4x32xf32>
    %106 = vector.shape_cast %105 : vector<1x4x32xf32> to vector<4x32xf32>
    %107 = vector.shape_cast %104 : vector<4x32xf32> to vector<1x4x32xf32>
    tpu.vector_store %arg5[%c0_81, %c0_82, %c96], %107 {strides = array<i32>} : memref<1x4x512xf32, #tpu.memory_space<vmem>>, vector<1x4x32xf32>,
    %c0_83 = arith.constant 0 : index
    %c0_84 = arith.constant 0 : index
    %c0_85 = arith.constant 0 : index
    %c4_86 = arith.constant 4 : index
    %c0_87 = arith.constant 0 : index
    %108 = vector.load %arg2[%c0_83, %c0_84, %c0_85, %c4_86, %c0_87] : memref<1x4x1x10x34xf32, #tpu.memory_space<vmem>>, vector<1x4x1x1x34xf32>
    %109 = vector.shape_cast %108 : vector<1x4x1x1x34xf32> to vector<4x34xf32>
    %110 = vector.extract_strided_slice %9 {offsets = [0, 0], sizes = [4, 32], strides = [1, 1]} : vector<4x34xf32> to vector<4x32xf32>
    %c0_88 = arith.constant 0 : index
    %c0_89 = arith.constant 0 : index
    %c0_90 = arith.constant 0 : index
    %111 = vector.load %arg6[%c0_88, %c0_89, %c0_90] : memref<2x36x32xf32, #tpu.memory_space<vmem>>, vector<1x4x32xf32>
    %112 = vector.shape_cast %111 : vector<1x4x32xf32> to vector<4x32xf32>
    %113 = vector.shape_cast %110 : vector<4x32xf32> to vector<1x4x32xf32>
    tpu.vector_store %arg6[%c0_88, %c0_89, %c0_90], %113 {strides = array<i32>} : memref<2x36x32xf32, #tpu.memory_space<vmem>>, vector<1x4x32xf32>,
    %114 = vector.extract_strided_slice %9 {offsets = [0, 1], sizes = [4, 32], strides = [1, 1]} : vector<4x34xf32> to vector<4x32xf32>
    %c0_91 = arith.constant 0 : index
    %c4_92 = arith.constant 4 : index
    %c0_93 = arith.constant 0 : index
    %115 = vector.load %arg6[%c0_91, %c4_92, %c0_93] : memref<2x36x32xf32, #tpu.memory_space<vmem>>, vector<1x4x32xf32>
    %116 = vector.shape_cast %115 : vector<1x4x32xf32> to vector<4x32xf32>
    %117 = vector.shape_cast %114 : vector<4x32xf32> to vector<1x4x32xf32>
    tpu.vector_store %arg6[%c0_91, %c4_92, %c0_93], %117 {strides = array<i32>} : memref<2x36x32xf32, #tpu.memory_space<vmem>>, vector<1x4x32xf32>,
    %118 = vector.extract_strided_slice %9 {offsets = [0, 2], sizes = [4, 32], strides = [1, 1]} : vector<4x34xf32> to vector<4x32xf32>
    %c0_94 = arith.constant 0 : index
    %c8_95 = arith.constant 8 : index
    %c0_96 = arith.constant 0 : index
    %119 = vector.load %arg6[%c0_94, %c8_95, %c0_96] : memref<2x36x32xf32, #tpu.memory_space<vmem>>, vector<1x4x32xf32>
    %120 = vector.shape_cast %119 : vector<1x4x32xf32> to vector<4x32xf32>
    %121 = vector.shape_cast %118 : vector<4x32xf32> to vector<1x4x32xf32>
    tpu.vector_store %arg6[%c0_94, %c8_95, %c0_96], %121 {strides = array<i32>} : memref<2x36x32xf32, #tpu.memory_space<vmem>>, vector<1x4x32xf32>,
    %122 = vector.extract_strided_slice %59 {offsets = [0, 0], sizes = [4, 32], strides = [1, 1]} : vector<4x34xf32> to vector<4x32xf32>
    %c0_97 = arith.constant 0 : index
    %c12_98 = arith.constant 12 : index
    %c0_99 = arith.constant 0 : index
    %123 = vector.load %arg6[%c0_97, %c12_98, %c0_99] : memref<2x36x32xf32, #tpu.memory_space<vmem>>, vector<1x4x32xf32>
    %124 = vector.shape_cast %123 : vector<1x4x32xf32> to vector<4x32xf32>
    %125 = vector.shape_cast %122 : vector<4x32xf32> to vector<1x4x32xf32>
    tpu.vector_store %arg6[%c0_97, %c12_98, %c0_99], %125 {strides = array<i32>} : memref<2x36x32xf32, #tpu.memory_space<vmem>>, vector<1x4x32xf32>,
    %126 = vector.extract_strided_slice %59 {offsets = [0, 1], sizes = [4, 32], strides = [1, 1]} : vector<4x34xf32> to vector<4x32xf32>
    %c0_100 = arith.constant 0 : index
    %c16_101 = arith.constant 16 : index
    %c0_102 = arith.constant 0 : index
    %127 = vector.load %arg6[%c0_100, %c16_101, %c0_102] : memref<2x36x32xf32, #tpu.memory_space<vmem>>, vector<1x4x32xf32>
    %128 = vector.shape_cast %127 : vector<1x4x32xf32> to vector<4x32xf32>
    %129 = vector.shape_cast %126 : vector<4x32xf32> to vector<1x4x32xf32>
    tpu.vector_store %arg6[%c0_100, %c16_101, %c0_102], %129 {strides = array<i32>} : memref<2x36x32xf32, #tpu.memory_space<vmem>>, vector<1x4x32xf32>,
    %130 = vector.extract_strided_slice %59 {offsets = [0, 2], sizes = [4, 32], strides = [1, 1]} : vector<4x34xf32> to vector<4x32xf32>
    %c0_103 = arith.constant 0 : index
    %c20_104 = arith.constant 20 : index
    %c0_105 = arith.constant 0 : index
    %131 = vector.load %arg6[%c0_103, %c20_104, %c0_105] : memref<2x36x32xf32, #tpu.memory_space<vmem>>, vector<1x4x32xf32>
    %132 = vector.shape_cast %131 : vector<1x4x32xf32> to vector<4x32xf32>
    %133 = vector.shape_cast %130 : vector<4x32xf32> to vector<1x4x32xf32>
    tpu.vector_store %arg6[%c0_103, %c20_104, %c0_105], %133 {strides = array<i32>} : memref<2x36x32xf32, #tpu.memory_space<vmem>>, vector<1x4x32xf32>,
    %134 = vector.extract_strided_slice %109 {offsets = [0, 0], sizes = [4, 32], strides = [1, 1]} : vector<4x34xf32> to vector<4x32xf32>
    %c0_106 = arith.constant 0 : index
    %c24_107 = arith.constant 24 : index
    %c0_108 = arith.constant 0 : index
    %135 = vector.load %arg6[%c0_106, %c24_107, %c0_108] : memref<2x36x32xf32, #tpu.memory_space<vmem>>, vector<1x4x32xf32>
    %136 = vector.shape_cast %135 : vector<1x4x32xf32> to vector<4x32xf32>
    %137 = vector.shape_cast %134 : vector<4x32xf32> to vector<1x4x32xf32>
    tpu.vector_store %arg6[%c0_106, %c24_107, %c0_108], %137 {strides = array<i32>} : memref<2x36x32xf32, #tpu.memory_space<vmem>>, vector<1x4x32xf32>,
    %138 = vector.extract_strided_slice %109 {offsets = [0, 1], sizes = [4, 32], strides = [1, 1]} : vector<4x34xf32> to vector<4x32xf32>
    %c0_109 = arith.constant 0 : index
    %c28_110 = arith.constant 28 : index
    %c0_111 = arith.constant 0 : index
    %139 = vector.load %arg6[%c0_109, %c28_110, %c0_111] : memref<2x36x32xf32, #tpu.memory_space<vmem>>, vector<1x4x32xf32>
    %140 = vector.shape_cast %139 : vector<1x4x32xf32> to vector<4x32xf32>
    %141 = vector.shape_cast %138 : vector<4x32xf32> to vector<1x4x32xf32>
    tpu.vector_store %arg6[%c0_109, %c28_110, %c0_111], %141 {strides = array<i32>} : memref<2x36x32xf32, #tpu.memory_space<vmem>>, vector<1x4x32xf32>,
    %142 = vector.extract_strided_slice %109 {offsets = [0, 2], sizes = [4, 32], strides = [1, 1]} : vector<4x34xf32> to vector<4x32xf32>
    %c0_112 = arith.constant 0 : index
    %c32_113 = arith.constant 32 : index
    %c0_114 = arith.constant 0 : index
    %143 = vector.load %arg6[%c0_112, %c32_113, %c0_114] : memref<2x36x32xf32, #tpu.memory_space<vmem>>, vector<1x4x32xf32>
    %144 = vector.shape_cast %143 : vector<1x4x32xf32> to vector<4x32xf32>
    %145 = vector.shape_cast %142 : vector<4x32xf32> to vector<1x4x32xf32>
    tpu.vector_store %arg6[%c0_112, %c32_113, %c0_114], %145 {strides = array<i32>} : memref<2x36x32xf32, #tpu.memory_space<vmem>>, vector<1x4x32xf32>,
    %c0_115 = arith.constant 0 : index
    %c0_116 = arith.constant 0 : index
    %c0_117 = arith.constant 0 : index
    %146 = vector.load %arg6[%c0_115, %c0_116, %c0_117] : memref<2x36x32xf32, #tpu.memory_space<vmem>>, vector<1x36x32xf32>
    %147 = vector.shape_cast %146 : vector<1x36x32xf32> to vector<36x32xf32>
    %cst_118 = arith.constant dense<0.000000e+00> : vector<8x32xf32>
    %148 = tpu.matmul %0, %147, %cst_118 {dimension_numbers = #tpu.dot_dimension_numbers<[1], [0], [0], [1], [0, 0, 1, 1], [], []>} : vector<8x36xf32>, vector<36x32xf32>, vector<8x32xf32> -> vector<8x32xf32>
    %149 = arith.addf %148, %3 : vector<8x32xf32>
    %150 = vector.extract_strided_slice %149 {offsets = [0, 0], sizes = [4, 32], strides = [1, 1]} : vector<8x32xf32> to vector<4x32xf32>
    %c0_119 = arith.constant 0 : index
    %c0_120 = arith.constant 0 : index
    %c128 = arith.constant 128 : index
    %151 = vector.load %arg5[%c0_119, %c0_120, %c128] : memref<1x4x512xf32, #tpu.memory_space<vmem>>, vector<1x4x32xf32>
    %152 = vector.shape_cast %151 : vector<1x4x32xf32> to vector<4x32xf32>
    %153 = vector.shape_cast %150 : vector<4x32xf32> to vector<1x4x32xf32>
    tpu.vector_store %arg5[%c0_119, %c0_120, %c128], %153 {strides = array<i32>} : memref<1x4x512xf32, #tpu.memory_space<vmem>>, vector<1x4x32xf32>,
    %154 = vector.extract_strided_slice %149 {offsets = [4, 0], sizes = [4, 32], strides = [1, 1]} : vector<8x32xf32> to vector<4x32xf32>
    %c0_121 = arith.constant 0 : index
    %c0_122 = arith.constant 0 : index
    %c160 = arith.constant 160 : index
    %155 = vector.load %arg5[%c0_121, %c0_122, %c160] : memref<1x4x512xf32, #tpu.memory_space<vmem>>, vector<1x4x32xf32>
    %156 = vector.shape_cast %155 : vector<1x4x32xf32> to vector<4x32xf32>
    %157 = vector.shape_cast %154 : vector<4x32xf32> to vector<1x4x32xf32>
    tpu.vector_store %arg5[%c0_121, %c0_122, %c160], %157 {strides = array<i32>} : memref<1x4x512xf32, #tpu.memory_space<vmem>>, vector<1x4x32xf32>,
    %c0_123 = arith.constant 0 : index
    %c0_124 = arith.constant 0 : index
    %c0_125 = arith.constant 0 : index
    %c5 = arith.constant 5 : index
    %c0_126 = arith.constant 0 : index
    %158 = vector.load %arg2[%c0_123, %c0_124, %c0_125, %c5, %c0_126] : memref<1x4x1x10x34xf32, #tpu.memory_space<vmem>>, vector<1x4x1x1x34xf32>
    %159 = vector.shape_cast %158 : vector<1x4x1x1x34xf32> to vector<4x34xf32>
    %160 = vector.extract_strided_slice %59 {offsets = [0, 0], sizes = [4, 32], strides = [1, 1]} : vector<4x34xf32> to vector<4x32xf32>
    %c1_127 = arith.constant 1 : index
    %c0_128 = arith.constant 0 : index
    %c0_129 = arith.constant 0 : index
    %161 = vector.load %arg6[%c1_127, %c0_128, %c0_129] : memref<2x36x32xf32, #tpu.memory_space<vmem>>, vector<1x4x32xf32>
    %162 = vector.shape_cast %161 : vector<1x4x32xf32> to vector<4x32xf32>
    %163 = vector.shape_cast %160 : vector<4x32xf32> to vector<1x4x32xf32>
    tpu.vector_store %arg6[%c1_127, %c0_128, %c0_129], %163 {strides = array<i32>} : memref<2x36x32xf32, #tpu.memory_space<vmem>>, vector<1x4x32xf32>,
    %164 = vector.extract_strided_slice %59 {offsets = [0, 1], sizes = [4, 32], strides = [1, 1]} : vector<4x34xf32> to vector<4x32xf32>
    %c1_130 = arith.constant 1 : index
    %c4_131 = arith.constant 4 : index
    %c0_132 = arith.constant 0 : index
    %165 = vector.load %arg6[%c1_130, %c4_131, %c0_132] : memref<2x36x32xf32, #tpu.memory_space<vmem>>, vector<1x4x32xf32>
    %166 = vector.shape_cast %165 : vector<1x4x32xf32> to vector<4x32xf32>
    %167 = vector.shape_cast %164 : vector<4x32xf32> to vector<1x4x32xf32>
    tpu.vector_store %arg6[%c1_130, %c4_131, %c0_132], %167 {strides = array<i32>} : memref<2x36x32xf32, #tpu.memory_space<vmem>>, vector<1x4x32xf32>,
    %168 = vector.extract_strided_slice %59 {offsets = [0, 2], sizes = [4, 32], strides = [1, 1]} : vector<4x34xf32> to vector<4x32xf32>
    %c1_133 = arith.constant 1 : index
    %c8_134 = arith.constant 8 : index
    %c0_135 = arith.constant 0 : index
    %169 = vector.load %arg6[%c1_133, %c8_134, %c0_135] : memref<2x36x32xf32, #tpu.memory_space<vmem>>, vector<1x4x32xf32>
    %170 = vector.shape_cast %169 : vector<1x4x32xf32> to vector<4x32xf32>
    %171 = vector.shape_cast %168 : vector<4x32xf32> to vector<1x4x32xf32>
    tpu.vector_store %arg6[%c1_133, %c8_134, %c0_135], %171 {strides = array<i32>} : memref<2x36x32xf32, #tpu.memory_space<vmem>>, vector<1x4x32xf32>,
    %172 = vector.extract_strided_slice %109 {offsets = [0, 0], sizes = [4, 32], strides = [1, 1]} : vector<4x34xf32> to vector<4x32xf32>
    %c1_136 = arith.constant 1 : index
    %c12_137 = arith.constant 12 : index
    %c0_138 = arith.constant 0 : index
    %173 = vector.load %arg6[%c1_136, %c12_137, %c0_138] : memref<2x36x32xf32, #tpu.memory_space<vmem>>, vector<1x4x32xf32>
    %174 = vector.shape_cast %173 : vector<1x4x32xf32> to vector<4x32xf32>
    %175 = vector.shape_cast %172 : vector<4x32xf32> to vector<1x4x32xf32>
    tpu.vector_store %arg6[%c1_136, %c12_137, %c0_138], %175 {strides = array<i32>} : memref<2x36x32xf32, #tpu.memory_space<vmem>>, vector<1x4x32xf32>,
    %176 = vector.extract_strided_slice %109 {offsets = [0, 1], sizes = [4, 32], strides = [1, 1]} : vector<4x34xf32> to vector<4x32xf32>
    %c1_139 = arith.constant 1 : index
    %c16_140 = arith.constant 16 : index
    %c0_141 = arith.constant 0 : index
    %177 = vector.load %arg6[%c1_139, %c16_140, %c0_141] : memref<2x36x32xf32, #tpu.memory_space<vmem>>, vector<1x4x32xf32>
    %178 = vector.shape_cast %177 : vector<1x4x32xf32> to vector<4x32xf32>
    %179 = vector.shape_cast %176 : vector<4x32xf32> to vector<1x4x32xf32>
    tpu.vector_store %arg6[%c1_139, %c16_140, %c0_141], %179 {strides = array<i32>} : memref<2x36x32xf32, #tpu.memory_space<vmem>>, vector<1x4x32xf32>,
    %180 = vector.extract_strided_slice %109 {offsets = [0, 2], sizes = [4, 32], strides = [1, 1]} : vector<4x34xf32> to vector<4x32xf32>
    %c1_142 = arith.constant 1 : index
    %c20_143 = arith.constant 20 : index
    %c0_144 = arith.constant 0 : index
    %181 = vector.load %arg6[%c1_142, %c20_143, %c0_144] : memref<2x36x32xf32, #tpu.memory_space<vmem>>, vector<1x4x32xf32>
    %182 = vector.shape_cast %181 : vector<1x4x32xf32> to vector<4x32xf32>
    %183 = vector.shape_cast %180 : vector<4x32xf32> to vector<1x4x32xf32>
    tpu.vector_store %arg6[%c1_142, %c20_143, %c0_144], %183 {strides = array<i32>} : memref<2x36x32xf32, #tpu.memory_space<vmem>>, vector<1x4x32xf32>,
    %184 = vector.extract_strided_slice %159 {offsets = [0, 0], sizes = [4, 32], strides = [1, 1]} : vector<4x34xf32> to vector<4x32xf32>
    %c1_145 = arith.constant 1 : index
    %c24_146 = arith.constant 24 : index
    %c0_147 = arith.constant 0 : index
    %185 = vector.load %arg6[%c1_145, %c24_146, %c0_147] : memref<2x36x32xf32, #tpu.memory_space<vmem>>, vector<1x4x32xf32>
    %186 = vector.shape_cast %185 : vector<1x4x32xf32> to vector<4x32xf32>
    %187 = vector.shape_cast %184 : vector<4x32xf32> to vector<1x4x32xf32>
    tpu.vector_store %arg6[%c1_145, %c24_146, %c0_147], %187 {strides = array<i32>} : memref<2x36x32xf32, #tpu.memory_space<vmem>>, vector<1x4x32xf32>,
    %188 = vector.extract_strided_slice %159 {offsets = [0, 1], sizes = [4, 32], strides = [1, 1]} : vector<4x34xf32> to vector<4x32xf32>
    %c1_148 = arith.constant 1 : index
    %c28_149 = arith.constant 28 : index
    %c0_150 = arith.constant 0 : index
    %189 = vector.load %arg6[%c1_148, %c28_149, %c0_150] : memref<2x36x32xf32, #tpu.memory_space<vmem>>, vector<1x4x32xf32>
    %190 = vector.shape_cast %189 : vector<1x4x32xf32> to vector<4x32xf32>
    %191 = vector.shape_cast %188 : vector<4x32xf32> to vector<1x4x32xf32>
    tpu.vector_store %arg6[%c1_148, %c28_149, %c0_150], %191 {strides = array<i32>} : memref<2x36x32xf32, #tpu.memory_space<vmem>>, vector<1x4x32xf32>,
    %192 = vector.extract_strided_slice %159 {offsets = [0, 2], sizes = [4, 32], strides = [1, 1]} : vector<4x34xf32> to vector<4x32xf32>
    %c1_151 = arith.constant 1 : index
    %c32_152 = arith.constant 32 : index
    %c0_153 = arith.constant 0 : index
    %193 = vector.load %arg6[%c1_151, %c32_152, %c0_153] : memref<2x36x32xf32, #tpu.memory_space<vmem>>, vector<1x4x32xf32>
    %194 = vector.shape_cast %193 : vector<1x4x32xf32> to vector<4x32xf32>
    %195 = vector.shape_cast %192 : vector<4x32xf32> to vector<1x4x32xf32>
    tpu.vector_store %arg6[%c1_151, %c32_152, %c0_153], %195 {strides = array<i32>} : memref<2x36x32xf32, #tpu.memory_space<vmem>>, vector<1x4x32xf32>,
    %c1_154 = arith.constant 1 : index
    %c0_155 = arith.constant 0 : index
    %c0_156 = arith.constant 0 : index
    %196 = vector.load %arg6[%c1_154, %c0_155, %c0_156] : memref<2x36x32xf32, #tpu.memory_space<vmem>>, vector<1x36x32xf32>
    %197 = vector.shape_cast %196 : vector<1x36x32xf32> to vector<36x32xf32>
    %cst_157 = arith.constant dense<0.000000e+00> : vector<8x32xf32>
    %198 = tpu.matmul %0, %197, %cst_157 {dimension_numbers = #tpu.dot_dimension_numbers<[1], [0], [0], [1], [0, 0, 1, 1], [], []>} : vector<8x36xf32>, vector<36x32xf32>, vector<8x32xf32> -> vector<8x32xf32>
    %199 = arith.addf %198, %3 : vector<8x32xf32>
    %200 = vector.extract_strided_slice %199 {offsets = [0, 0], sizes = [4, 32], strides = [1, 1]} : vector<8x32xf32> to vector<4x32xf32>
    %c0_158 = arith.constant 0 : index
    %c0_159 = arith.constant 0 : index
    %c192 = arith.constant 192 : index
    %201 = vector.load %arg5[%c0_158, %c0_159, %c192] : memref<1x4x512xf32, #tpu.memory_space<vmem>>, vector<1x4x32xf32>
    %202 = vector.shape_cast %201 : vector<1x4x32xf32> to vector<4x32xf32>
    %203 = vector.shape_cast %200 : vector<4x32xf32> to vector<1x4x32xf32>
    tpu.vector_store %arg5[%c0_158, %c0_159, %c192], %203 {strides = array<i32>} : memref<1x4x512xf32, #tpu.memory_space<vmem>>, vector<1x4x32xf32>,
    %204 = vector.extract_strided_slice %199 {offsets = [4, 0], sizes = [4, 32], strides = [1, 1]} : vector<8x32xf32> to vector<4x32xf32>
    %c0_160 = arith.constant 0 : index
    %c0_161 = arith.constant 0 : index
    %c224 = arith.constant 224 : index
    %205 = vector.load %arg5[%c0_160, %c0_161, %c224] : memref<1x4x512xf32, #tpu.memory_space<vmem>>, vector<1x4x32xf32>
    %206 = vector.shape_cast %205 : vector<1x4x32xf32> to vector<4x32xf32>
    %207 = vector.shape_cast %204 : vector<4x32xf32> to vector<1x4x32xf32>
    tpu.vector_store %arg5[%c0_160, %c0_161, %c224], %207 {strides = array<i32>} : memref<1x4x512xf32, #tpu.memory_space<vmem>>, vector<1x4x32xf32>,
    %c0_162 = arith.constant 0 : index
    %c0_163 = arith.constant 0 : index
    %c0_164 = arith.constant 0 : index
    %c6 = arith.constant 6 : index
    %c0_165 = arith.constant 0 : index
    %208 = vector.load %arg2[%c0_162, %c0_163, %c0_164, %c6, %c0_165] : memref<1x4x1x10x34xf32, #tpu.memory_space<vmem>>, vector<1x4x1x1x34xf32>
    %209 = vector.shape_cast %208 : vector<1x4x1x1x34xf32> to vector<4x34xf32>
    %210 = vector.extract_strided_slice %109 {offsets = [0, 0], sizes = [4, 32], strides = [1, 1]} : vector<4x34xf32> to vector<4x32xf32>
    %c0_166 = arith.constant 0 : index
    %c0_167 = arith.constant 0 : index
    %c0_168 = arith.constant 0 : index
    %211 = vector.load %arg6[%c0_166, %c0_167, %c0_168] : memref<2x36x32xf32, #tpu.memory_space<vmem>>, vector<1x4x32xf32>
    %212 = vector.shape_cast %211 : vector<1x4x32xf32> to vector<4x32xf32>
    %213 = vector.shape_cast %210 : vector<4x32xf32> to vector<1x4x32xf32>
    tpu.vector_store %arg6[%c0_166, %c0_167, %c0_168], %213 {strides = array<i32>} : memref<2x36x32xf32, #tpu.memory_space<vmem>>, vector<1x4x32xf32>,
    %214 = vector.extract_strided_slice %109 {offsets = [0, 1], sizes = [4, 32], strides = [1, 1]} : vector<4x34xf32> to vector<4x32xf32>
    %c0_169 = arith.constant 0 : index
    %c4_170 = arith.constant 4 : index
    %c0_171 = arith.constant 0 : index
    %215 = vector.load %arg6[%c0_169, %c4_170, %c0_171] : memref<2x36x32xf32, #tpu.memory_space<vmem>>, vector<1x4x32xf32>
    %216 = vector.shape_cast %215 : vector<1x4x32xf32> to vector<4x32xf32>
    %217 = vector.shape_cast %214 : vector<4x32xf32> to vector<1x4x32xf32>
    tpu.vector_store %arg6[%c0_169, %c4_170, %c0_171], %217 {strides = array<i32>} : memref<2x36x32xf32, #tpu.memory_space<vmem>>, vector<1x4x32xf32>,
    %218 = vector.extract_strided_slice %109 {offsets = [0, 2], sizes = [4, 32], strides = [1, 1]} : vector<4x34xf32> to vector<4x32xf32>
    %c0_172 = arith.constant 0 : index
    %c8_173 = arith.constant 8 : index
    %c0_174 = arith.constant 0 : index
    %219 = vector.load %arg6[%c0_172, %c8_173, %c0_174] : memref<2x36x32xf32, #tpu.memory_space<vmem>>, vector<1x4x32xf32>
    %220 = vector.shape_cast %219 : vector<1x4x32xf32> to vector<4x32xf32>
    %221 = vector.shape_cast %218 : vector<4x32xf32> to vector<1x4x32xf32>
    tpu.vector_store %arg6[%c0_172, %c8_173, %c0_174], %221 {strides = array<i32>} : memref<2x36x32xf32, #tpu.memory_space<vmem>>, vector<1x4x32xf32>,
    %222 = vector.extract_strided_slice %159 {offsets = [0, 0], sizes = [4, 32], strides = [1, 1]} : vector<4x34xf32> to vector<4x32xf32>
    %c0_175 = arith.constant 0 : index
    %c12_176 = arith.constant 12 : index
    %c0_177 = arith.constant 0 : index
    %223 = vector.load %arg6[%c0_175, %c12_176, %c0_177] : memref<2x36x32xf32, #tpu.memory_space<vmem>>, vector<1x4x32xf32>
    %224 = vector.shape_cast %223 : vector<1x4x32xf32> to vector<4x32xf32>
    %225 = vector.shape_cast %222 : vector<4x32xf32> to vector<1x4x32xf32>
    tpu.vector_store %arg6[%c0_175, %c12_176, %c0_177], %225 {strides = array<i32>} : memref<2x36x32xf32, #tpu.memory_space<vmem>>, vector<1x4x32xf32>,
    %226 = vector.extract_strided_slice %159 {offsets = [0, 1], sizes = [4, 32], strides = [1, 1]} : vector<4x34xf32> to vector<4x32xf32>
    %c0_178 = arith.constant 0 : index
    %c16_179 = arith.constant 16 : index
    %c0_180 = arith.constant 0 : index
    %227 = vector.load %arg6[%c0_178, %c16_179, %c0_180] : memref<2x36x32xf32, #tpu.memory_space<vmem>>, vector<1x4x32xf32>
    %228 = vector.shape_cast %227 : vector<1x4x32xf32> to vector<4x32xf32>
    %229 = vector.shape_cast %226 : vector<4x32xf32> to vector<1x4x32xf32>
    tpu.vector_store %arg6[%c0_178, %c16_179, %c0_180], %229 {strides = array<i32>} : memref<2x36x32xf32, #tpu.memory_space<vmem>>, vector<1x4x32xf32>,
    %230 = vector.extract_strided_slice %159 {offsets = [0, 2], sizes = [4, 32], strides = [1, 1]} : vector<4x34xf32> to vector<4x32xf32>
    %c0_181 = arith.constant 0 : index
    %c20_182 = arith.constant 20 : index
    %c0_183 = arith.constant 0 : index
    %231 = vector.load %arg6[%c0_181, %c20_182, %c0_183] : memref<2x36x32xf32, #tpu.memory_space<vmem>>, vector<1x4x32xf32>
    %232 = vector.shape_cast %231 : vector<1x4x32xf32> to vector<4x32xf32>
    %233 = vector.shape_cast %230 : vector<4x32xf32> to vector<1x4x32xf32>
    tpu.vector_store %arg6[%c0_181, %c20_182, %c0_183], %233 {strides = array<i32>} : memref<2x36x32xf32, #tpu.memory_space<vmem>>, vector<1x4x32xf32>,
    %234 = vector.extract_strided_slice %209 {offsets = [0, 0], sizes = [4, 32], strides = [1, 1]} : vector<4x34xf32> to vector<4x32xf32>
    %c0_184 = arith.constant 0 : index
    %c24_185 = arith.constant 24 : index
    %c0_186 = arith.constant 0 : index
    %235 = vector.load %arg6[%c0_184, %c24_185, %c0_186] : memref<2x36x32xf32, #tpu.memory_space<vmem>>, vector<1x4x32xf32>
    %236 = vector.shape_cast %235 : vector<1x4x32xf32> to vector<4x32xf32>
    %237 = vector.shape_cast %234 : vector<4x32xf32> to vector<1x4x32xf32>
    tpu.vector_store %arg6[%c0_184, %c24_185, %c0_186], %237 {strides = array<i32>} : memref<2x36x32xf32, #tpu.memory_space<vmem>>, vector<1x4x32xf32>,
    %238 = vector.extract_strided_slice %209 {offsets = [0, 1], sizes = [4, 32], strides = [1, 1]} : vector<4x34xf32> to vector<4x32xf32>
    %c0_187 = arith.constant 0 : index
    %c28_188 = arith.constant 28 : index
    %c0_189 = arith.constant 0 : index
    %239 = vector.load %arg6[%c0_187, %c28_188, %c0_189] : memref<2x36x32xf32, #tpu.memory_space<vmem>>, vector<1x4x32xf32>
    %240 = vector.shape_cast %239 : vector<1x4x32xf32> to vector<4x32xf32>
    %241 = vector.shape_cast %238 : vector<4x32xf32> to vector<1x4x32xf32>
    tpu.vector_store %arg6[%c0_187, %c28_188, %c0_189], %241 {strides = array<i32>} : memref<2x36x32xf32, #tpu.memory_space<vmem>>, vector<1x4x32xf32>,
    %242 = vector.extract_strided_slice %209 {offsets = [0, 2], sizes = [4, 32], strides = [1, 1]} : vector<4x34xf32> to vector<4x32xf32>
    %c0_190 = arith.constant 0 : index
    %c32_191 = arith.constant 32 : index
    %c0_192 = arith.constant 0 : index
    %243 = vector.load %arg6[%c0_190, %c32_191, %c0_192] : memref<2x36x32xf32, #tpu.memory_space<vmem>>, vector<1x4x32xf32>
    %244 = vector.shape_cast %243 : vector<1x4x32xf32> to vector<4x32xf32>
    %245 = vector.shape_cast %242 : vector<4x32xf32> to vector<1x4x32xf32>
    tpu.vector_store %arg6[%c0_190, %c32_191, %c0_192], %245 {strides = array<i32>} : memref<2x36x32xf32, #tpu.memory_space<vmem>>, vector<1x4x32xf32>,
    %c0_193 = arith.constant 0 : index
    %c0_194 = arith.constant 0 : index
    %c0_195 = arith.constant 0 : index
    %246 = vector.load %arg6[%c0_193, %c0_194, %c0_195] : memref<2x36x32xf32, #tpu.memory_space<vmem>>, vector<1x36x32xf32>
    %247 = vector.shape_cast %246 : vector<1x36x32xf32> to vector<36x32xf32>
    %cst_196 = arith.constant dense<0.000000e+00> : vector<8x32xf32>
    %248 = tpu.matmul %0, %247, %cst_196 {dimension_numbers = #tpu.dot_dimension_numbers<[1], [0], [0], [1], [0, 0, 1, 1], [], []>} : vector<8x36xf32>, vector<36x32xf32>, vector<8x32xf32> -> vector<8x32xf32>
    %249 = arith.addf %248, %3 : vector<8x32xf32>
    %250 = vector.extract_strided_slice %249 {offsets = [0, 0], sizes = [4, 32], strides = [1, 1]} : vector<8x32xf32> to vector<4x32xf32>
    %c0_197 = arith.constant 0 : index
    %c0_198 = arith.constant 0 : index
    %c256 = arith.constant 256 : index
    %251 = vector.load %arg5[%c0_197, %c0_198, %c256] : memref<1x4x512xf32, #tpu.memory_space<vmem>>, vector<1x4x32xf32>
    %252 = vector.shape_cast %251 : vector<1x4x32xf32> to vector<4x32xf32>
    %253 = vector.shape_cast %250 : vector<4x32xf32> to vector<1x4x32xf32>
    tpu.vector_store %arg5[%c0_197, %c0_198, %c256], %253 {strides = array<i32>} : memref<1x4x512xf32, #tpu.memory_space<vmem>>, vector<1x4x32xf32>,
    %254 = vector.extract_strided_slice %249 {offsets = [4, 0], sizes = [4, 32], strides = [1, 1]} : vector<8x32xf32> to vector<4x32xf32>
    %c0_199 = arith.constant 0 : index
    %c0_200 = arith.constant 0 : index
    %c288 = arith.constant 288 : index
    %255 = vector.load %arg5[%c0_199, %c0_200, %c288] : memref<1x4x512xf32, #tpu.memory_space<vmem>>, vector<1x4x32xf32>
    %256 = vector.shape_cast %255 : vector<1x4x32xf32> to vector<4x32xf32>
    %257 = vector.shape_cast %254 : vector<4x32xf32> to vector<1x4x32xf32>
    tpu.vector_store %arg5[%c0_199, %c0_200, %c288], %257 {strides = array<i32>} : memref<1x4x512xf32, #tpu.memory_space<vmem>>, vector<1x4x32xf32>,
    %c0_201 = arith.constant 0 : index
    %c0_202 = arith.constant 0 : index
    %c0_203 = arith.constant 0 : index
    %c7 = arith.constant 7 : index
    %c0_204 = arith.constant 0 : index
    %258 = vector.load %arg2[%c0_201, %c0_202, %c0_203, %c7, %c0_204] : memref<1x4x1x10x34xf32, #tpu.memory_space<vmem>>, vector<1x4x1x1x34xf32>
    %259 = vector.shape_cast %258 : vector<1x4x1x1x34xf32> to vector<4x34xf32>
    %260 = vector.extract_strided_slice %159 {offsets = [0, 0], sizes = [4, 32], strides = [1, 1]} : vector<4x34xf32> to vector<4x32xf32>
    %c1_205 = arith.constant 1 : index
    %c0_206 = arith.constant 0 : index
    %c0_207 = arith.constant 0 : index
    %261 = vector.load %arg6[%c1_205, %c0_206, %c0_207] : memref<2x36x32xf32, #tpu.memory_space<vmem>>, vector<1x4x32xf32>
    %262 = vector.shape_cast %261 : vector<1x4x32xf32> to vector<4x32xf32>
    %263 = vector.shape_cast %260 : vector<4x32xf32> to vector<1x4x32xf32>
    tpu.vector_store %arg6[%c1_205, %c0_206, %c0_207], %263 {strides = array<i32>} : memref<2x36x32xf32, #tpu.memory_space<vmem>>, vector<1x4x32xf32>,
    %264 = vector.extract_strided_slice %159 {offsets = [0, 1], sizes = [4, 32], strides = [1, 1]} : vector<4x34xf32> to vector<4x32xf32>
    %c1_208 = arith.constant 1 : index
    %c4_209 = arith.constant 4 : index
    %c0_210 = arith.constant 0 : index
    %265 = vector.load %arg6[%c1_208, %c4_209, %c0_210] : memref<2x36x32xf32, #tpu.memory_space<vmem>>, vector<1x4x32xf32>
    %266 = vector.shape_cast %265 : vector<1x4x32xf32> to vector<4x32xf32>
    %267 = vector.shape_cast %264 : vector<4x32xf32> to vector<1x4x32xf32>
    tpu.vector_store %arg6[%c1_208, %c4_209, %c0_210], %267 {strides = array<i32>} : memref<2x36x32xf32, #tpu.memory_space<vmem>>, vector<1x4x32xf32>,
    %268 = vector.extract_strided_slice %159 {offsets = [0, 2], sizes = [4, 32], strides = [1, 1]} : vector<4x34xf32> to vector<4x32xf32>
    %c1_211 = arith.constant 1 : index
    %c8_212 = arith.constant 8 : index
    %c0_213 = arith.constant 0 : index
    %269 = vector.load %arg6[%c1_211, %c8_212, %c0_213] : memref<2x36x32xf32, #tpu.memory_space<vmem>>, vector<1x4x32xf32>
    %270 = vector.shape_cast %269 : vector<1x4x32xf32> to vector<4x32xf32>
    %271 = vector.shape_cast %268 : vector<4x32xf32> to vector<1x4x32xf32>
    tpu.vector_store %arg6[%c1_211, %c8_212, %c0_213], %271 {strides = array<i32>} : memref<2x36x32xf32, #tpu.memory_space<vmem>>, vector<1x4x32xf32>,
    %272 = vector.extract_strided_slice %209 {offsets = [0, 0], sizes = [4, 32], strides = [1, 1]} : vector<4x34xf32> to vector<4x32xf32>
    %c1_214 = arith.constant 1 : index
    %c12_215 = arith.constant 12 : index
    %c0_216 = arith.constant 0 : index
    %273 = vector.load %arg6[%c1_214, %c12_215, %c0_216] : memref<2x36x32xf32, #tpu.memory_space<vmem>>, vector<1x4x32xf32>
    %274 = vector.shape_cast %273 : vector<1x4x32xf32> to vector<4x32xf32>
    %275 = vector.shape_cast %272 : vector<4x32xf32> to vector<1x4x32xf32>
    tpu.vector_store %arg6[%c1_214, %c12_215, %c0_216], %275 {strides = array<i32>} : memref<2x36x32xf32, #tpu.memory_space<vmem>>, vector<1x4x32xf32>,
    %276 = vector.extract_strided_slice %209 {offsets = [0, 1], sizes = [4, 32], strides = [1, 1]} : vector<4x34xf32> to vector<4x32xf32>
    %c1_217 = arith.constant 1 : index
    %c16_218 = arith.constant 16 : index
    %c0_219 = arith.constant 0 : index
    %277 = vector.load %arg6[%c1_217, %c16_218, %c0_219] : memref<2x36x32xf32, #tpu.memory_space<vmem>>, vector<1x4x32xf32>
    %278 = vector.shape_cast %277 : vector<1x4x32xf32> to vector<4x32xf32>
    %279 = vector.shape_cast %276 : vector<4x32xf32> to vector<1x4x32xf32>
    tpu.vector_store %arg6[%c1_217, %c16_218, %c0_219], %279 {strides = array<i32>} : memref<2x36x32xf32, #tpu.memory_space<vmem>>, vector<1x4x32xf32>,
    %280 = vector.extract_strided_slice %209 {offsets = [0, 2], sizes = [4, 32], strides = [1, 1]} : vector<4x34xf32> to vector<4x32xf32>
    %c1_220 = arith.constant 1 : index
    %c20_221 = arith.constant 20 : index
    %c0_222 = arith.constant 0 : index
    %281 = vector.load %arg6[%c1_220, %c20_221, %c0_222] : memref<2x36x32xf32, #tpu.memory_space<vmem>>, vector<1x4x32xf32>
    %282 = vector.shape_cast %281 : vector<1x4x32xf32> to vector<4x32xf32>
    %283 = vector.shape_cast %280 : vector<4x32xf32> to vector<1x4x32xf32>
    tpu.vector_store %arg6[%c1_220, %c20_221, %c0_222], %283 {strides = array<i32>} : memref<2x36x32xf32, #tpu.memory_space<vmem>>, vector<1x4x32xf32>,
    %284 = vector.extract_strided_slice %259 {offsets = [0, 0], sizes = [4, 32], strides = [1, 1]} : vector<4x34xf32> to vector<4x32xf32>
    %c1_223 = arith.constant 1 : index
    %c24_224 = arith.constant 24 : index
    %c0_225 = arith.constant 0 : index
    %285 = vector.load %arg6[%c1_223, %c24_224, %c0_225] : memref<2x36x32xf32, #tpu.memory_space<vmem>>, vector<1x4x32xf32>
    %286 = vector.shape_cast %285 : vector<1x4x32xf32> to vector<4x32xf32>
    %287 = vector.shape_cast %284 : vector<4x32xf32> to vector<1x4x32xf32>
    tpu.vector_store %arg6[%c1_223, %c24_224, %c0_225], %287 {strides = array<i32>} : memref<2x36x32xf32, #tpu.memory_space<vmem>>, vector<1x4x32xf32>,
    %288 = vector.extract_strided_slice %259 {offsets = [0, 1], sizes = [4, 32], strides = [1, 1]} : vector<4x34xf32> to vector<4x32xf32>
    %c1_226 = arith.constant 1 : index
    %c28_227 = arith.constant 28 : index
    %c0_228 = arith.constant 0 : index
    %289 = vector.load %arg6[%c1_226, %c28_227, %c0_228] : memref<2x36x32xf32, #tpu.memory_space<vmem>>, vector<1x4x32xf32>
    %290 = vector.shape_cast %289 : vector<1x4x32xf32> to vector<4x32xf32>
    %291 = vector.shape_cast %288 : vector<4x32xf32> to vector<1x4x32xf32>
    tpu.vector_store %arg6[%c1_226, %c28_227, %c0_228], %291 {strides = array<i32>} : memref<2x36x32xf32, #tpu.memory_space<vmem>>, vector<1x4x32xf32>,
    %292 = vector.extract_strided_slice %259 {offsets = [0, 2], sizes = [4, 32], strides = [1, 1]} : vector<4x34xf32> to vector<4x32xf32>
    %c1_229 = arith.constant 1 : index
    %c32_230 = arith.constant 32 : index
    %c0_231 = arith.constant 0 : index
    %293 = vector.load %arg6[%c1_229, %c32_230, %c0_231] : memref<2x36x32xf32, #tpu.memory_space<vmem>>, vector<1x4x32xf32>
    %294 = vector.shape_cast %293 : vector<1x4x32xf32> to vector<4x32xf32>
    %295 = vector.shape_cast %292 : vector<4x32xf32> to vector<1x4x32xf32>
    tpu.vector_store %arg6[%c1_229, %c32_230, %c0_231], %295 {strides = array<i32>} : memref<2x36x32xf32, #tpu.memory_space<vmem>>, vector<1x4x32xf32>,
    %c1_232 = arith.constant 1 : index
    %c0_233 = arith.constant 0 : index
    %c0_234 = arith.constant 0 : index
    %296 = vector.load %arg6[%c1_232, %c0_233, %c0_234] : memref<2x36x32xf32, #tpu.memory_space<vmem>>, vector<1x36x32xf32>
    %297 = vector.shape_cast %296 : vector<1x36x32xf32> to vector<36x32xf32>
    %cst_235 = arith.constant dense<0.000000e+00> : vector<8x32xf32>
    %298 = tpu.matmul %0, %297, %cst_235 {dimension_numbers = #tpu.dot_dimension_numbers<[1], [0], [0], [1], [0, 0, 1, 1], [], []>} : vector<8x36xf32>, vector<36x32xf32>, vector<8x32xf32> -> vector<8x32xf32>
    %299 = arith.addf %298, %3 : vector<8x32xf32>
    %300 = vector.extract_strided_slice %299 {offsets = [0, 0], sizes = [4, 32], strides = [1, 1]} : vector<8x32xf32> to vector<4x32xf32>
    %c0_236 = arith.constant 0 : index
    %c0_237 = arith.constant 0 : index
    %c320 = arith.constant 320 : index
    %301 = vector.load %arg5[%c0_236, %c0_237, %c320] : memref<1x4x512xf32, #tpu.memory_space<vmem>>, vector<1x4x32xf32>
    %302 = vector.shape_cast %301 : vector<1x4x32xf32> to vector<4x32xf32>
    %303 = vector.shape_cast %300 : vector<4x32xf32> to vector<1x4x32xf32>
    tpu.vector_store %arg5[%c0_236, %c0_237, %c320], %303 {strides = array<i32>} : memref<1x4x512xf32, #tpu.memory_space<vmem>>, vector<1x4x32xf32>,
    %304 = vector.extract_strided_slice %299 {offsets = [4, 0], sizes = [4, 32], strides = [1, 1]} : vector<8x32xf32> to vector<4x32xf32>
    %c0_238 = arith.constant 0 : index
    %c0_239 = arith.constant 0 : index
    %c352 = arith.constant 352 : index
    %305 = vector.load %arg5[%c0_238, %c0_239, %c352] : memref<1x4x512xf32, #tpu.memory_space<vmem>>, vector<1x4x32xf32>
    %306 = vector.shape_cast %305 : vector<1x4x32xf32> to vector<4x32xf32>
    %307 = vector.shape_cast %304 : vector<4x32xf32> to vector<1x4x32xf32>
    tpu.vector_store %arg5[%c0_238, %c0_239, %c352], %307 {strides = array<i32>} : memref<1x4x512xf32, #tpu.memory_space<vmem>>, vector<1x4x32xf32>,
    %c0_240 = arith.constant 0 : index
    %c0_241 = arith.constant 0 : index
    %c0_242 = arith.constant 0 : index
    %c8_243 = arith.constant 8 : index
    %c0_244 = arith.constant 0 : index
    %308 = vector.load %arg2[%c0_240, %c0_241, %c0_242, %c8_243, %c0_244] : memref<1x4x1x10x34xf32, #tpu.memory_space<vmem>>, vector<1x4x1x1x34xf32>
    %309 = vector.shape_cast %308 : vector<1x4x1x1x34xf32> to vector<4x34xf32>
    %310 = vector.extract_strided_slice %209 {offsets = [0, 0], sizes = [4, 32], strides = [1, 1]} : vector<4x34xf32> to vector<4x32xf32>
    %c0_245 = arith.constant 0 : index
    %c0_246 = arith.constant 0 : index
    %c0_247 = arith.constant 0 : index
    %311 = vector.load %arg6[%c0_245, %c0_246, %c0_247] : memref<2x36x32xf32, #tpu.memory_space<vmem>>, vector<1x4x32xf32>
    %312 = vector.shape_cast %311 : vector<1x4x32xf32> to vector<4x32xf32>
    %313 = vector.shape_cast %310 : vector<4x32xf32> to vector<1x4x32xf32>
    tpu.vector_store %arg6[%c0_245, %c0_246, %c0_247], %313 {strides = array<i32>} : memref<2x36x32xf32, #tpu.memory_space<vmem>>, vector<1x4x32xf32>,
    %314 = vector.extract_strided_slice %209 {offsets = [0, 1], sizes = [4, 32], strides = [1, 1]} : vector<4x34xf32> to vector<4x32xf32>
    %c0_248 = arith.constant 0 : index
    %c4_249 = arith.constant 4 : index
    %c0_250 = arith.constant 0 : index
    %315 = vector.load %arg6[%c0_248, %c4_249, %c0_250] : memref<2x36x32xf32, #tpu.memory_space<vmem>>, vector<1x4x32xf32>
    %316 = vector.shape_cast %315 : vector<1x4x32xf32> to vector<4x32xf32>
    %317 = vector.shape_cast %314 : vector<4x32xf32> to vector<1x4x32xf32>
    tpu.vector_store %arg6[%c0_248, %c4_249, %c0_250], %317 {strides = array<i32>} : memref<2x36x32xf32, #tpu.memory_space<vmem>>, vector<1x4x32xf32>,
    %318 = vector.extract_strided_slice %209 {offsets = [0, 2], sizes = [4, 32], strides = [1, 1]} : vector<4x34xf32> to vector<4x32xf32>
    %c0_251 = arith.constant 0 : index
    %c8_252 = arith.constant 8 : index
    %c0_253 = arith.constant 0 : index
    %319 = vector.load %arg6[%c0_251, %c8_252, %c0_253] : memref<2x36x32xf32, #tpu.memory_space<vmem>>, vector<1x4x32xf32>
    %320 = vector.shape_cast %319 : vector<1x4x32xf32> to vector<4x32xf32>
    %321 = vector.shape_cast %318 : vector<4x32xf32> to vector<1x4x32xf32>
    tpu.vector_store %arg6[%c0_251, %c8_252, %c0_253], %321 {strides = array<i32>} : memref<2x36x32xf32, #tpu.memory_space<vmem>>, vector<1x4x32xf32>,
    %322 = vector.extract_strided_slice %259 {offsets = [0, 0], sizes = [4, 32], strides = [1, 1]} : vector<4x34xf32> to vector<4x32xf32>
    %c0_254 = arith.constant 0 : index
    %c12_255 = arith.constant 12 : index
    %c0_256 = arith.constant 0 : index
    %323 = vector.load %arg6[%c0_254, %c12_255, %c0_256] : memref<2x36x32xf32, #tpu.memory_space<vmem>>, vector<1x4x32xf32>
    %324 = vector.shape_cast %323 : vector<1x4x32xf32> to vector<4x32xf32>
    %325 = vector.shape_cast %322 : vector<4x32xf32> to vector<1x4x32xf32>
    tpu.vector_store %arg6[%c0_254, %c12_255, %c0_256], %325 {strides = array<i32>} : memref<2x36x32xf32, #tpu.memory_space<vmem>>, vector<1x4x32xf32>,
    %326 = vector.extract_strided_slice %259 {offsets = [0, 1], sizes = [4, 32], strides = [1, 1]} : vector<4x34xf32> to vector<4x32xf32>
    %c0_257 = arith.constant 0 : index
    %c16_258 = arith.constant 16 : index
    %c0_259 = arith.constant 0 : index
    %327 = vector.load %arg6[%c0_257, %c16_258, %c0_259] : memref<2x36x32xf32, #tpu.memory_space<vmem>>, vector<1x4x32xf32>
    %328 = vector.shape_cast %327 : vector<1x4x32xf32> to vector<4x32xf32>
    %329 = vector.shape_cast %326 : vector<4x32xf32> to vector<1x4x32xf32>
    tpu.vector_store %arg6[%c0_257, %c16_258, %c0_259], %329 {strides = array<i32>} : memref<2x36x32xf32, #tpu.memory_space<vmem>>, vector<1x4x32xf32>,
    %330 = vector.extract_strided_slice %259 {offsets = [0, 2], sizes = [4, 32], strides = [1, 1]} : vector<4x34xf32> to vector<4x32xf32>
    %c0_260 = arith.constant 0 : index
    %c20_261 = arith.constant 20 : index
    %c0_262 = arith.constant 0 : index
    %331 = vector.load %arg6[%c0_260, %c20_261, %c0_262] : memref<2x36x32xf32, #tpu.memory_space<vmem>>, vector<1x4x32xf32>
    %332 = vector.shape_cast %331 : vector<1x4x32xf32> to vector<4x32xf32>
    %333 = vector.shape_cast %330 : vector<4x32xf32> to vector<1x4x32xf32>
    tpu.vector_store %arg6[%c0_260, %c20_261, %c0_262], %333 {strides = array<i32>} : memref<2x36x32xf32, #tpu.memory_space<vmem>>, vector<1x4x32xf32>,
    %334 = vector.extract_strided_slice %309 {offsets = [0, 0], sizes = [4, 32], strides = [1, 1]} : vector<4x34xf32> to vector<4x32xf32>
    %c0_263 = arith.constant 0 : index
    %c24_264 = arith.constant 24 : index
    %c0_265 = arith.constant 0 : index
    %335 = vector.load %arg6[%c0_263, %c24_264, %c0_265] : memref<2x36x32xf32, #tpu.memory_space<vmem>>, vector<1x4x32xf32>
    %336 = vector.shape_cast %335 : vector<1x4x32xf32> to vector<4x32xf32>
    %337 = vector.shape_cast %334 : vector<4x32xf32> to vector<1x4x32xf32>
    tpu.vector_store %arg6[%c0_263, %c24_264, %c0_265], %337 {strides = array<i32>} : memref<2x36x32xf32, #tpu.memory_space<vmem>>, vector<1x4x32xf32>,
    %338 = vector.extract_strided_slice %309 {offsets = [0, 1], sizes = [4, 32], strides = [1, 1]} : vector<4x34xf32> to vector<4x32xf32>
    %c0_266 = arith.constant 0 : index
    %c28_267 = arith.constant 28 : index
    %c0_268 = arith.constant 0 : index
    %339 = vector.load %arg6[%c0_266, %c28_267, %c0_268] : memref<2x36x32xf32, #tpu.memory_space<vmem>>, vector<1x4x32xf32>
    %340 = vector.shape_cast %339 : vector<1x4x32xf32> to vector<4x32xf32>
    %341 = vector.shape_cast %338 : vector<4x32xf32> to vector<1x4x32xf32>
    tpu.vector_store %arg6[%c0_266, %c28_267, %c0_268], %341 {strides = array<i32>} : memref<2x36x32xf32, #tpu.memory_space<vmem>>, vector<1x4x32xf32>,
    %342 = vector.extract_strided_slice %309 {offsets = [0, 2], sizes = [4, 32], strides = [1, 1]} : vector<4x34xf32> to vector<4x32xf32>
    %c0_269 = arith.constant 0 : index
    %c32_270 = arith.constant 32 : index
    %c0_271 = arith.constant 0 : index
    %343 = vector.load %arg6[%c0_269, %c32_270, %c0_271] : memref<2x36x32xf32, #tpu.memory_space<vmem>>, vector<1x4x32xf32>
    %344 = vector.shape_cast %343 : vector<1x4x32xf32> to vector<4x32xf32>
    %345 = vector.shape_cast %342 : vector<4x32xf32> to vector<1x4x32xf32>
    tpu.vector_store %arg6[%c0_269, %c32_270, %c0_271], %345 {strides = array<i32>} : memref<2x36x32xf32, #tpu.memory_space<vmem>>, vector<1x4x32xf32>,
    %c0_272 = arith.constant 0 : index
    %c0_273 = arith.constant 0 : index
    %c0_274 = arith.constant 0 : index
    %346 = vector.load %arg6[%c0_272, %c0_273, %c0_274] : memref<2x36x32xf32, #tpu.memory_space<vmem>>, vector<1x36x32xf32>
    %347 = vector.shape_cast %346 : vector<1x36x32xf32> to vector<36x32xf32>
    %cst_275 = arith.constant dense<0.000000e+00> : vector<8x32xf32>
    %348 = tpu.matmul %0, %347, %cst_275 {dimension_numbers = #tpu.dot_dimension_numbers<[1], [0], [0], [1], [0, 0, 1, 1], [], []>} : vector<8x36xf32>, vector<36x32xf32>, vector<8x32xf32> -> vector<8x32xf32>
    %349 = arith.addf %348, %3 : vector<8x32xf32>
    %350 = vector.extract_strided_slice %349 {offsets = [0, 0], sizes = [4, 32], strides = [1, 1]} : vector<8x32xf32> to vector<4x32xf32>
    %c0_276 = arith.constant 0 : index
    %c0_277 = arith.constant 0 : index
    %c384 = arith.constant 384 : index
    %351 = vector.load %arg5[%c0_276, %c0_277, %c384] : memref<1x4x512xf32, #tpu.memory_space<vmem>>, vector<1x4x32xf32>
    %352 = vector.shape_cast %351 : vector<1x4x32xf32> to vector<4x32xf32>
    %353 = vector.shape_cast %350 : vector<4x32xf32> to vector<1x4x32xf32>
    tpu.vector_store %arg5[%c0_276, %c0_277, %c384], %353 {strides = array<i32>} : memref<1x4x512xf32, #tpu.memory_space<vmem>>, vector<1x4x32xf32>,
    %354 = vector.extract_strided_slice %349 {offsets = [4, 0], sizes = [4, 32], strides = [1, 1]} : vector<8x32xf32> to vector<4x32xf32>
    %c0_278 = arith.constant 0 : index
    %c0_279 = arith.constant 0 : index
    %c416 = arith.constant 416 : index
    %355 = vector.load %arg5[%c0_278, %c0_279, %c416] : memref<1x4x512xf32, #tpu.memory_space<vmem>>, vector<1x4x32xf32>
    %356 = vector.shape_cast %355 : vector<1x4x32xf32> to vector<4x32xf32>
    %357 = vector.shape_cast %354 : vector<4x32xf32> to vector<1x4x32xf32>
    tpu.vector_store %arg5[%c0_278, %c0_279, %c416], %357 {strides = array<i32>} : memref<1x4x512xf32, #tpu.memory_space<vmem>>, vector<1x4x32xf32>,
    %c0_280 = arith.constant 0 : index
    %c0_281 = arith.constant 0 : index
    %c0_282 = arith.constant 0 : index
    %c9 = arith.constant 9 : index
    %c0_283 = arith.constant 0 : index
    %358 = vector.load %arg2[%c0_280, %c0_281, %c0_282, %c9, %c0_283] : memref<1x4x1x10x34xf32, #tpu.memory_space<vmem>>, vector<1x4x1x1x34xf32>
    %359 = vector.shape_cast %358 : vector<1x4x1x1x34xf32> to vector<4x34xf32>
    %360 = vector.extract_strided_slice %259 {offsets = [0, 0], sizes = [4, 32], strides = [1, 1]} : vector<4x34xf32> to vector<4x32xf32>
    %c1_284 = arith.constant 1 : index
    %c0_285 = arith.constant 0 : index
    %c0_286 = arith.constant 0 : index
    %361 = vector.load %arg6[%c1_284, %c0_285, %c0_286] : memref<2x36x32xf32, #tpu.memory_space<vmem>>, vector<1x4x32xf32>
    %362 = vector.shape_cast %361 : vector<1x4x32xf32> to vector<4x32xf32>
    %363 = vector.shape_cast %360 : vector<4x32xf32> to vector<1x4x32xf32>
    tpu.vector_store %arg6[%c1_284, %c0_285, %c0_286], %363 {strides = array<i32>} : memref<2x36x32xf32, #tpu.memory_space<vmem>>, vector<1x4x32xf32>,
    %364 = vector.extract_strided_slice %259 {offsets = [0, 1], sizes = [4, 32], strides = [1, 1]} : vector<4x34xf32> to vector<4x32xf32>
    %c1_287 = arith.constant 1 : index
    %c4_288 = arith.constant 4 : index
    %c0_289 = arith.constant 0 : index
    %365 = vector.load %arg6[%c1_287, %c4_288, %c0_289] : memref<2x36x32xf32, #tpu.memory_space<vmem>>, vector<1x4x32xf32>
    %366 = vector.shape_cast %365 : vector<1x4x32xf32> to vector<4x32xf32>
    %367 = vector.shape_cast %364 : vector<4x32xf32> to vector<1x4x32xf32>
    tpu.vector_store %arg6[%c1_287, %c4_288, %c0_289], %367 {strides = array<i32>} : memref<2x36x32xf32, #tpu.memory_space<vmem>>, vector<1x4x32xf32>,
    %368 = vector.extract_strided_slice %259 {offsets = [0, 2], sizes = [4, 32], strides = [1, 1]} : vector<4x34xf32> to vector<4x32xf32>
    %c1_290 = arith.constant 1 : index
    %c8_291 = arith.constant 8 : index
    %c0_292 = arith.constant 0 : index
    %369 = vector.load %arg6[%c1_290, %c8_291, %c0_292] : memref<2x36x32xf32, #tpu.memory_space<vmem>>, vector<1x4x32xf32>
    %370 = vector.shape_cast %369 : vector<1x4x32xf32> to vector<4x32xf32>
    %371 = vector.shape_cast %368 : vector<4x32xf32> to vector<1x4x32xf32>
    tpu.vector_store %arg6[%c1_290, %c8_291, %c0_292], %371 {strides = array<i32>} : memref<2x36x32xf32, #tpu.memory_space<vmem>>, vector<1x4x32xf32>,
    %372 = vector.extract_strided_slice %309 {offsets = [0, 0], sizes = [4, 32], strides = [1, 1]} : vector<4x34xf32> to vector<4x32xf32>
    %c1_293 = arith.constant 1 : index
    %c12_294 = arith.constant 12 : index
    %c0_295 = arith.constant 0 : index
    %373 = vector.load %arg6[%c1_293, %c12_294, %c0_295] : memref<2x36x32xf32, #tpu.memory_space<vmem>>, vector<1x4x32xf32>
    %374 = vector.shape_cast %373 : vector<1x4x32xf32> to vector<4x32xf32>
    %375 = vector.shape_cast %372 : vector<4x32xf32> to vector<1x4x32xf32>
    tpu.vector_store %arg6[%c1_293, %c12_294, %c0_295], %375 {strides = array<i32>} : memref<2x36x32xf32, #tpu.memory_space<vmem>>, vector<1x4x32xf32>,
    %376 = vector.extract_strided_slice %309 {offsets = [0, 1], sizes = [4, 32], strides = [1, 1]} : vector<4x34xf32> to vector<4x32xf32>
    %c1_296 = arith.constant 1 : index
    %c16_297 = arith.constant 16 : index
    %c0_298 = arith.constant 0 : index
    %377 = vector.load %arg6[%c1_296, %c16_297, %c0_298] : memref<2x36x32xf32, #tpu.memory_space<vmem>>, vector<1x4x32xf32>
    %378 = vector.shape_cast %377 : vector<1x4x32xf32> to vector<4x32xf32>
    %379 = vector.shape_cast %376 : vector<4x32xf32> to vector<1x4x32xf32>
    tpu.vector_store %arg6[%c1_296, %c16_297, %c0_298], %379 {strides = array<i32>} : memref<2x36x32xf32, #tpu.memory_space<vmem>>, vector<1x4x32xf32>,
    %380 = vector.extract_strided_slice %309 {offsets = [0, 2], sizes = [4, 32], strides = [1, 1]} : vector<4x34xf32> to vector<4x32xf32>
    %c1_299 = arith.constant 1 : index
    %c20_300 = arith.constant 20 : index
    %c0_301 = arith.constant 0 : index
    %381 = vector.load %arg6[%c1_299, %c20_300, %c0_301] : memref<2x36x32xf32, #tpu.memory_space<vmem>>, vector<1x4x32xf32>
    %382 = vector.shape_cast %381 : vector<1x4x32xf32> to vector<4x32xf32>
    %383 = vector.shape_cast %380 : vector<4x32xf32> to vector<1x4x32xf32>
    tpu.vector_store %arg6[%c1_299, %c20_300, %c0_301], %383 {strides = array<i32>} : memref<2x36x32xf32, #tpu.memory_space<vmem>>, vector<1x4x32xf32>,
    %384 = vector.extract_strided_slice %359 {offsets = [0, 0], sizes = [4, 32], strides = [1, 1]} : vector<4x34xf32> to vector<4x32xf32>
    %c1_302 = arith.constant 1 : index
    %c24_303 = arith.constant 24 : index
    %c0_304 = arith.constant 0 : index
    %385 = vector.load %arg6[%c1_302, %c24_303, %c0_304] : memref<2x36x32xf32, #tpu.memory_space<vmem>>, vector<1x4x32xf32>
    %386 = vector.shape_cast %385 : vector<1x4x32xf32> to vector<4x32xf32>
    %387 = vector.shape_cast %384 : vector<4x32xf32> to vector<1x4x32xf32>
    tpu.vector_store %arg6[%c1_302, %c24_303, %c0_304], %387 {strides = array<i32>} : memref<2x36x32xf32, #tpu.memory_space<vmem>>, vector<1x4x32xf32>,
    %388 = vector.extract_strided_slice %359 {offsets = [0, 1], sizes = [4, 32], strides = [1, 1]} : vector<4x34xf32> to vector<4x32xf32>
    %c1_305 = arith.constant 1 : index
    %c28_306 = arith.constant 28 : index
    %c0_307 = arith.constant 0 : index
    %389 = vector.load %arg6[%c1_305, %c28_306, %c0_307] : memref<2x36x32xf32, #tpu.memory_space<vmem>>, vector<1x4x32xf32>
    %390 = vector.shape_cast %389 : vector<1x4x32xf32> to vector<4x32xf32>
    %391 = vector.shape_cast %388 : vector<4x32xf32> to vector<1x4x32xf32>
    tpu.vector_store %arg6[%c1_305, %c28_306, %c0_307], %391 {strides = array<i32>} : memref<2x36x32xf32, #tpu.memory_space<vmem>>, vector<1x4x32xf32>,
    %392 = vector.extract_strided_slice %359 {offsets = [0, 2], sizes = [4, 32], strides = [1, 1]} : vector<4x34xf32> to vector<4x32xf32>
    %c1_308 = arith.constant 1 : index
    %c32_309 = arith.constant 32 : index
    %c0_310 = arith.constant 0 : index
    %393 = vector.load %arg6[%c1_308, %c32_309, %c0_310] : memref<2x36x32xf32, #tpu.memory_space<vmem>>, vector<1x4x32xf32>
    %394 = vector.shape_cast %393 : vector<1x4x32xf32> to vector<4x32xf32>
    %395 = vector.shape_cast %392 : vector<4x32xf32> to vector<1x4x32xf32>
    tpu.vector_store %arg6[%c1_308, %c32_309, %c0_310], %395 {strides = array<i32>} : memref<2x36x32xf32, #tpu.memory_space<vmem>>, vector<1x4x32xf32>,
    %c1_311 = arith.constant 1 : index
    %c0_312 = arith.constant 0 : index
    %c0_313 = arith.constant 0 : index
    %396 = vector.load %arg6[%c1_311, %c0_312, %c0_313] : memref<2x36x32xf32, #tpu.memory_space<vmem>>, vector<1x36x32xf32>
    %397 = vector.shape_cast %396 : vector<1x36x32xf32> to vector<36x32xf32>
    %cst_314 = arith.constant dense<0.000000e+00> : vector<8x32xf32>
    %398 = tpu.matmul %0, %397, %cst_314 {dimension_numbers = #tpu.dot_dimension_numbers<[1], [0], [0], [1], [0, 0, 1, 1], [], []>} : vector<8x36xf32>, vector<36x32xf32>, vector<8x32xf32> -> vector<8x32xf32>
    %399 = arith.addf %398, %3 : vector<8x32xf32>
    %400 = vector.extract_strided_slice %399 {offsets = [0, 0], sizes = [4, 32], strides = [1, 1]} : vector<8x32xf32> to vector<4x32xf32>
    %c0_315 = arith.constant 0 : index
    %c0_316 = arith.constant 0 : index
    %c448 = arith.constant 448 : index
    %401 = vector.load %arg5[%c0_315, %c0_316, %c448] : memref<1x4x512xf32, #tpu.memory_space<vmem>>, vector<1x4x32xf32>
    %402 = vector.shape_cast %401 : vector<1x4x32xf32> to vector<4x32xf32>
    %403 = vector.shape_cast %400 : vector<4x32xf32> to vector<1x4x32xf32>
    tpu.vector_store %arg5[%c0_315, %c0_316, %c448], %403 {strides = array<i32>} : memref<1x4x512xf32, #tpu.memory_space<vmem>>, vector<1x4x32xf32>,
    %404 = vector.extract_strided_slice %399 {offsets = [4, 0], sizes = [4, 32], strides = [1, 1]} : vector<8x32xf32> to vector<4x32xf32>
    %c0_317 = arith.constant 0 : index
    %c0_318 = arith.constant 0 : index
    %c480 = arith.constant 480 : index
    %405 = vector.load %arg5[%c0_317, %c0_318, %c480] : memref<1x4x512xf32, #tpu.memory_space<vmem>>, vector<1x4x32xf32>
    %406 = vector.shape_cast %405 : vector<1x4x32xf32> to vector<4x32xf32>
    %407 = vector.shape_cast %404 : vector<4x32xf32> to vector<1x4x32xf32>
    tpu.vector_store %arg5[%c0_317, %c0_318, %c480], %407 {strides = array<i32>} : memref<1x4x512xf32, #tpu.memory_space<vmem>>, vector<1x4x32xf32>,
    return
  }
  func.func @transform_0(%arg0: i32, %arg1: i32) -> (i32, i32, i32, i32, i32) {
    %c0_i32 = arith.constant 0 : i32
    %c0_i32_0 = arith.constant 0 : i32
    %c0_i32_1 = arith.constant 0 : i32
    %c0_i32_2 = arith.constant 0 : i32
    return %arg0, %c0_i32, %arg1, %c0_i32_0, %c0_i32_1 : i32, i32, i32, i32, i32
  }
  func.func @transform_1(%arg0: i32, %arg1: i32) -> (i32, i32) {
    %c0_i32 = arith.constant 0 : i32
    %c0_i32_0 = arith.constant 0 : i32
    %c0_i32_1 = arith.constant 0 : i32
    return %c0_i32, %c0_i32_0 : i32, i32
  }
  func.func @transform_2(%arg0: i32, %arg1: i32) -> (i32, i32) {
    %c0_i32 = arith.constant 0 : i32
    %c0_i32_0 = arith.constant 0 : i32
    %c0_i32_1 = arith.constant 0 : i32
    return %c0_i32, %c0_i32_0 : i32, i32
  }
  func.func @transform_3(%arg0: i32, %arg1: i32) -> (i32, i32, i32) {
    %c0_i32 = arith.constant 0 : i32
    %c0_i32_0 = arith.constant 0 : i32
    return %arg0, %c0_i32, %arg1 : i32, i32, i32
  }
}

</mosaic_0001>

<bundles_post_ra>
// kernel: upsample_conv2d.1
= control target key start
LH: loop header
LB: loop body
LE: loop exit
PB: predicated region body
PF: predicated region fallthrough
CT: control target
= control target key end

     0   :  { %s1681_s12 = smov 0   ;;  %s1683_s13 = smov 0   ;;  %s2156_s0 = inlined_call_operand.vmem [shape: f32[2,4,2,10,34], index: 0, kind: input, shape index: {}]   ;;  %s2157_s1 = inlined_call_operand.vmem [shape: f32[8,36], index: 1, kind: input, shape index: {}]   ;;  %s2158_s2 = inlined_call_operand.vmem [shape: f32[8,1], index: 2, kind: input, shape index: {}]   ;;  %s2159_s3 = inlined_call_operand.vmem [shape: f32[2,4,1024], index: 3, kind: output, shape index: {}]  }
   0x1   :  { %s1685_s14 = smov 0   ;;  %s1687_s15 = smov 0  }
   0x2   :  { %s1689_s16 = smov 0   ;;  %s1691_s17 = smov 0  }
   0x3   :  { %s1693_s18 = smov 0  }
   0x4 LB: > { %s22_s19 = sadd.s32 1, %s1643_s16  ;;  %s25_s20 = sadd.s32 1, %s1647_s17  ;;  %s1651_s18 = sphi %s1693_s18, %s13_s18   ;;  %s1647_s17 = sphi %s1691_s17, %s2165_s17   ;;  %s1643_s16 = sphi %s1689_s16, %s2164_s16   ;;  %s1639_s15 = sphi %s1687_s15, %s2163_s15   ;;  %s1635_s14 = sphi %s1685_s14, %s2162_s14   ;;  %s1631_s13 = sphi %s1683_s13, %s2161_s13   ;;  %s1627_s12 = sphi %s1681_s12, %s2160_s12  }
   0x5   : > { %p23_p0 = scmp.ge.s32.totalorder %s22_s19, 2  ;;  %p41_p1 = scmp.ne.s32.totalorder %s1631_s13, %s1627_s12 }
   0x6   : > { %p42_p2 = scmp.eq.s32.totalorder %s1651_s18, 0  ;;  %s34_s24 = sadd.s32 1, %s1631_s13 }
   0x7   : > { %s2167_s19 = smov (%p23_p0, %s22_s19), 0  ;;  %s2169_s20 = smov (!%p23_p0, %s25_s20), %s1647_s17 }
   0x8   : > { %p43_p3 = por %p42_p2, %p41_p1  ;;  %p27_p4 = scmp.ge.s32.totalorder %s2169_s20, 2 }
   0x9   : > { %s30_s21 = ssub.s32 %s1643_s16, %s2167_s19  ;;  %p1352_p6 = scmp.ge.s32.totalorder %s1651_s18, 4 }
   0xa   : > { %s2171_s20 = smov (%p27_p4, %s2169_s20), 0 }
   0xb   : > { %s29_s22 = ssub.s32 %s1647_s17, %s2171_s20  ;;  %143 = sbr.rel (%p1352_p6) target bundleno = 27 (0x1b), region = 24 }
   0xc   : > { %s31_s23 = sor.u32 %s30_s21, %s29_s22 }
   0xd   : > { %p32_p5 = scmp.eq.s32.totalorder %s31_s23, 0 }
   0xf   : > { %s1732_s25 = scalar_select %p32_p5, %s1631_s13, %s34_s24  }
  0x10   : > { %146 = sbr.rel (!%p43_p3) target bundleno = 27 (0x1b), region = 28  ;;  %s148_s26 = sand.u32 (%p43_p3), 1, %s1631_s13  }
  0x11   : > { %s1354_s27 = sshll.u32 (%p43_p3), %s1643_s16, 1  ;;  %s1353_s28 = sshll.u32 (%p43_p3), %s148_s26, 6 }
  0x12   : > { %s1355_s29 = sshll.u32 (%p43_p3), %s1647_s17, 4  ;;  %s150_s8 = scalar_lea.vmem (%p43_p3), [#allocation3], %s1353_s28 }
  0x13   : > { %s153_s30 = sadd.s32 (%p43_p3), %s1355_s29, %s1354_s27 }
  0x14   : > { %s1356_s4 = sshll.u32 (%p43_p3), %s153_s30, 3 }
  0x15   : > { %s155_s7 = scalar_lea.vmem %s2156_s0, %s1356_s4 }
  0x16   : > { %v198_v0 = vld [vmem:[%s155_s7] sm:$0xff]  ;;  %v200_v1 = vld [vmem:[%s155_s7 + $0x8] sm:$0xff] }
  0x17   : > { %v202_v2 = vld [vmem:[%s155_s7 + $0x20] sm:$0xff]  ;;  %199 = vst [vmem:[%s150_s8] sm:$0xff] %v198_v0  ;;  %201 = vst [vmem:[%s150_s8 + $0x8] sm:$0xff] %v200_v1  ;;  %v204_v3 = vld [vmem:[%s155_s7 + $0x28] sm:$0xff] }
  0x18   : > { %203 = vst [vmem:[%s150_s8 + $0x10] sm:$0xff] %v202_v2  ;;  %v206_v4 = vld [vmem:[%s155_s7 + $0x40] sm:$0xff]  ;;  %v208_v5 = vld [vmem:[%s155_s7 + $0x48] sm:$0xff]  ;;  %205 = vst [vmem:[%s150_s8 + $0x18] sm:$0xff] %v204_v3 }
  0x19   : > { %207 = vst [vmem:[%s150_s8 + $0x20] sm:$0xff] %v206_v4  ;;  %209 = vst [vmem:[%s150_s8 + $0x28] sm:$0xff] %v208_v5  ;;  %v210_v6 = vld [vmem:[%s155_s7 + $0x60] sm:$0xff]  ;;  %v212_v7 = vld [vmem:[%s155_s7 + $0x68] sm:$0xff] }
  0x1a   : > { %211 = vst [vmem:[%s150_s8 + $0x30] sm:$0xff] %v210_v6  ;;  %213 = vst [vmem:[%s150_s8 + $0x38] sm:$0xff] %v212_v7 }
  0x1b PF: > { %p1357_p7 = scmp.ge.s32.totalorder %s1651_s18, 1  ;;  %p218_p8 = scmp.lt.s32.totalorder %s1651_s18, 5 }
  0x1d   : > { %p219_p9 = pnand %p1357_p7, %p218_p8 }
  0x1e   : > { %s225_s9 = sand.u32 (!%p219_p9), 1, %s1627_s12   ;;  %s1654_s12 = smov (!%p219_p9), 126  }
  0x1f   : > { %222 = sbr.rel (%p219_p9) target bundleno = 541 (0x21d), region = 66  ;;  %s1358_s10 = sshll.u32 (!%p219_p9), %s225_s9, 6 }
  0x20   : > { %s1744_s11 = scalar_lea.vmem (!%p219_p9), [#allocation3], %s1358_s10  ;;  %s1655_s21 = smov (!%p219_p9), 127  }
  0x21   : > { %s1359_s27 = sshll.u32 (!%p219_p9), %s1635_s14, 2  ;;  %p253_p10 = scmp.lt.s32.totalorder (!%p219_p9), %s1639_s15, 1 }
  0x22   : > { %p255_p11 = scmp.lt.s32.totalorder (!%p219_p9), %s1359_s27, 7  ;;  %s1658_s14 = smov (!%p219_p9), 64  }
  0x23   : > { %s1660_s7 = smov (!%p219_p9), 96  }
  0x24   : > { %vm286_vm0 = vcmask 1041409   ;;  %vm289_vm1 = vcmask 1042434   ;;  %vm292_vm2 = vcmask 1043459   ;;  %v436_v8 = vld [vmem:[%s1744_s11 + $0x3] sm:$0x1]  ;;  %v1653_v11 = vmov 0.0  }
  0x25   : > { %v437_v9 = vld [vmem:[%s1744_s11 + $0x13] sm:$0x1]  ;;  %v438_v10 = vld [vmem:[%s1744_s11 + $0x23] sm:$0x1]  ;;  %1428 = vmatprep.subr.mxu0 %v1653_v11  ;;  %1441 = vmatprep.subr.mxu1 %v1653_v11  ;;  %v277_v15 = vld [vmem:[%s1744_s11 + $0x2] sm:$0x1] }
  0x26   : > { %v439_v12 = vld [vmem:[%s1744_s11 + $0x33] sm:$0x1]  ;;  %v451_v13 = vrot.slane %v437_v9, 7  ;;  %v453_v14 = vrot.slane %v438_v10, 6  ;;  %v278_v17 = vld [vmem:[%s1744_s11 + $0x12] sm:$0x1] }
  0x27   : > { %v455_v16 = vrot.slane %v439_v12, 5  ;;  %v279_v18 = vld [vmem:[%s1744_s11 + $0x22] sm:$0x1]  ;;  %v280_v20 = vld [vmem:[%s1744_s11 + $0x32] sm:$0x1]  ;;  %v329_v21 = vrot.slane %v278_v17, 7 }
  0x28   : > { %v452_v19 = vsel %vm286_vm0, %v451_v13, %v436_v8  ;;  %v331_v22 = vrot.slane %v279_v18, 6  ;;  %v273_v23 = vld [vmem:[%s1744_s11 + $0x1] sm:$0x1]  ;;  %vm295_vm3 = vcmask 257024   ;;  %v333_v25 = vrot.slane %v280_v20, 5  ;;  %s2173_s15 = smov (!%p253_p10, %s1639_s15), 1 }
  0x29   : > { %v454_v24 = vsel %vm289_vm1, %v453_v14, %v452_v19  ;;  %v274_v26 = vld [vmem:[%s1744_s11 + $0x11] sm:$0x1]  ;;  %v275_v27 = vld [vmem:[%s1744_s11 + $0x21] sm:$0x1]  ;;  %v330_v29 = vsel %vm286_vm0, %v329_v21, %v277_v15  ;;  %v269_v33 = vld [vmem:[%s1744_s11] sm:$0x1] }
  0x2a   : > { %v1762_v28 = vsel %vm292_vm2, %v455_v16, %v454_v24  ;;  %v276_v30 = vld [vmem:[%s1744_s11 + $0x31] sm:$0x1]  ;;  %v309_v31 = vrot.slane %v274_v26, 7  ;;  %v311_v32 = vrot.slane %v275_v27, 6  ;;  %v332_v34 = vsel %vm289_vm1, %v331_v22, %v330_v29  ;;  %v270_v36 = vld [vmem:[%s1744_s11 + $0x10] sm:$0x1] }
  0x2b   : > { %463 = vrot.lane.b32.xlu1 %v1762_v28, %s1654_s12  ;;  %458 = vst.msk [vmem:[#allocation2 + $0x40] sm:$0xf] %vm295_vm3, %v1762_v28  ;;  %v313_v35 = vrot.slane %v276_v30, 5  ;;  %v271_v37 = vld [vmem:[%s1744_s11 + $0x20] sm:$0x1]  ;;  %v1775_v38 = vsel %vm292_vm2, %v333_v25, %v332_v34  ;;  %v285_v41 = vrot.slane %v270_v36, 7 }
  0x2c   : > { %v310_v39 = vsel %vm286_vm0, %v309_v31, %v273_v23  ;;  %v272_v40 = vld [vmem:[%s1744_s11 + $0x30] sm:$0x1]  ;;  %v288_v42 = vrot.slane %v271_v37, 6  ;;  %341 = vrot.lane.b32.xlu0 %v1775_v38, %s1654_s12  ;;  %336 = vst.msk [vmem:[#allocation2 + $0x18] sm:$0xf] %vm295_vm3, %v1775_v38  ;;  %vm1656_vm4 = vmmov 0  }
  0x2d   : > { %444 = vst.msk [vmem:[#allocation2 + $0x34] sm:$0xf] %vm295_vm3, %v1775_v38  ;;  %v312_v43 = vsel %vm289_vm1, %v311_v32, %v310_v39  ;;  %v291_v44 = vrot.slane %v272_v40, 5  ;;  %v558_v45 = vld [vmem:[%s1744_s11 + $0x14] sm:$0x1]  ;;  %v287_v47 = vsel %vm286_vm0, %v285_v41, %v269_v33  ;;  %1438 = vmatprep.mubr.msk.f32.mxu0 %vm1656_vm4, %v1653_v11  ;;  %1451 = vmatprep.mubr.msk.f32.mxu1 %vm1656_vm4, %v1653_v11  ;;  %vm354_vm5 = vcmask 1043456  }
  0x2e   : > { %v314_v46 = vsel %vm292_vm2, %v313_v35, %v312_v43  ;;  %v559_v48 = vld [vmem:[%s1744_s11 + $0x24] sm:$0x1]  ;;  %v571_v49 = vrot.slane %v558_v45, 7  ;;  %v290_v50 = vsel %vm289_vm1, %v288_v42, %v287_v47  ;;  %v560_v53 = vld [vmem:[%s1744_s11 + $0x34] sm:$0x1]  ;;  %vm350_vm6 = vcmask 293888  }
  0x2f   : > { %317 = vrot.lane.b32.xlu1 %v314_v46, %s1655_s21  ;;  %316 = vst.msk [vmem:[#allocation2 + $0xc] sm:$0xf] %vm295_vm3, %v314_v46  ;;  %441 = vst.msk [vmem:[#allocation2 + $0x28] sm:$0xf] %vm295_vm3, %v314_v46  ;;  %v557_v51 = vld [vmem:[%s1744_s11 + $0x4] sm:$0x1]  ;;  %v293_v52 = vsel %vm292_vm2, %v291_v44, %v290_v50 }
  0x30   : > { %337 = vrot.lane.b32.xlu0 %v1775_v38, %s1655_s21  ;;  %296 = vst.msk [vmem:[#allocation2] sm:$0xf] %vm295_vm3, %v293_v52  ;;  %v573_v54 = vrot.slane %v559_v48, 6  ;;  %v673_v55 = vld [vmem:[%s1744_s11 + $0x15] sm:$0x1]  ;;  %v572_v56 = vsel %vm286_vm0, %v571_v49, %v557_v51  ;;  %v575_v58 = vrot.slane %v560_v53, 5 }
  0x31   : > { %v791_v57 = vld [vmem:[%s1744_s11 + $0x16] sm:$0x1]  ;;  %v674_v59 = vld [vmem:[%s1744_s11 + $0x25] sm:$0x1]  ;;  %v686_v60 = vrot.slane %v673_v55, 7  ;;  %v1657_v49 = vmov 0  }
  0x32   : > { %v574_v61 = vsel %vm289_vm1, %v573_v54, %v572_v56  ;;  %v672_v62 = vld [vmem:[%s1744_s11 + $0x5] sm:$0x1]  ;;  %v792_v63 = vld [vmem:[%s1744_s11 + $0x26] sm:$0x1]  ;;  %v804_v0 = vrot.slane %v791_v57, 7  ;;  %v688_v2 = vrot.slane %v674_v59, 6  ;;  %1596 = vset.pattern.permute.xlu0 %v1657_v49 }
  0x33   : > { %459 = vrot.lane.b32.xlu1 %v1762_v28, %s1655_s21  ;;  %v675_v1 = vld [vmem:[%s1744_s11 + $0x35] sm:$0x1]  ;;  %v790_v3 = vld [vmem:[%s1744_s11 + $0x6] sm:$0x1]  ;;  %v1814_v4 = vsel %vm292_vm2, %v575_v58, %v574_v61  ;;  %v687_v5 = vsel %vm286_vm0, %v686_v60, %v672_v62  ;;  %v793_v6 = vld [vmem:[%s1744_s11 + $0x36] sm:$0x1] }
  0x34   : > { %321 = vrot.lane.b32.xlu0 %v314_v46, %s1654_s12  ;;  %v806_v7 = vrot.slane %v792_v63, 6  ;;  %v906_v8 = vld [vmem:[%s1744_s11 + $0x17] sm:$0x1]  ;;  %v690_v9 = vrot.slane %v675_v1, 5  ;;  %v805_v10 = vsel %vm286_vm0, %v804_v0, %v790_v3  ;;  %v689_v12 = vsel %vm289_vm1, %v688_v2, %v687_v5  ;;  %v1024_v13 = vld [vmem:[%s1744_s11 + $0x18] sm:$0x1] }
  0x35   : > { %v808_v14 = vrot.slane %v793_v6, 5  ;;  %v907_v15 = vld [vmem:[%s1744_s11 + $0x27] sm:$0x1]  ;;  %v919_v16 = vrot.slane %v906_v8, 7  ;;  %v1025_v20 = vld [vmem:[%s1744_s11 + $0x28] sm:$0x1] }
  0x36   : > { %v807_v17 = vsel %vm289_vm1, %v806_v7, %v805_v10  ;;  %v905_v18 = vld [vmem:[%s1744_s11 + $0x7] sm:$0x1]  ;;  %v1835_v19 = vsel %vm292_vm2, %v690_v9, %v689_v12  ;;  %v1037_v21 = vrot.slane %v1024_v13, 7  ;;  %v908_v22 = vld [vmem:[%s1744_s11 + $0x37] sm:$0x1]  ;;  %v921_v23 = vrot.slane %v907_v15, 6 }
  0x37   : > { %297 = vrot.lane.b32.xlu1 %v293_v52, %s1655_s21  ;;  %v1023_v24 = vld [vmem:[%s1744_s11 + $0x8] sm:$0x1]  ;;  %v1843_v25 = vsel %vm292_vm2, %v808_v14, %v807_v17  ;;  %v920_v26 = vsel %vm286_vm0, %v919_v16, %v905_v18  ;;  %v1026_v27 = vld [vmem:[%s1744_s11 + $0x38] sm:$0x1]  ;;  %v1039_v29 = vrot.slane %v1025_v20, 6  ;;  %v923_v31 = vrot.slane %v908_v22, 5 }
  0x38   : > { %301 = vrot.lane.b32.xlu0 %v293_v52, %s1654_s12  ;;  %v1139_v30 = vld [vmem:[%s1744_s11 + $0x19] sm:$0x1]  ;;  %v1038_v32 = vsel %vm286_vm0, %v1037_v21, %v1023_v24  ;;  %v922_v33 = vsel %vm289_vm1, %v921_v23, %v920_v26  ;;  %v1041_v34 = vrot.slane %v1026_v27, 5  ;;  %v1140_v35 = vld [vmem:[%s1744_s11 + $0x29] sm:$0x1]  ;;  %v263_v48 = vld [vmem:[%s2158_s2] sm:$0xff] }
  0x39   : > { %v1152_v36 = vrot.slane %v1139_v30, 7  ;;  %v1040_v37 = vsel %vm289_vm1, %v1039_v29, %v1038_v32  ;;  %v1138_v39 = vld [vmem:[%s1744_s11 + $0x9] sm:$0x1]  ;;  %v1860_v40 = vsel %vm292_vm2, %v923_v31, %v922_v33  ;;  %v1141_v41 = vld [vmem:[%s1744_s11 + $0x39] sm:$0x1]  ;;  %v1154_v42 = vrot.slane %v1140_v35, 6 }
  0x3a   : > { %v1866_v43 = vsel %vm292_vm2, %v1041_v34, %v1040_v37  ;;  %v1156_v45 = vrot.slane %v1141_v41, 5  ;;  %s2175_s27 = smov (!%p255_p11, %s1359_s27), 7  ;;  %s1360_s28 = sshll.u32 %s2173_s15, 3  ;;  %vm434_vm7 = vcmask 519424   ;;  %vm549_vm8 = vcmask 781824  }
  0x3b   : > { %579 = vrot.lane.b32.xlu1 %v1814_v4, %s1655_s21  ;;  %v1153_v44 = vsel %vm286_vm0, %v1152_v36, %v1138_v39  ;;  %s258_s29 = sadd.s32 %s1360_s28, %s2175_s27  ;;  %s1659_s15 = smov 32   ;;  %vm555_vm9 = vcmask 1044224  }
  0x3c   : > { %583 = vrot.lane.b32.xlu0 %v1814_v4, %s1654_s12  ;;  %v1155_v46 = vsel %vm289_vm1, %v1154_v42, %v1153_v44  ;;  %s1361_s30 = sshll.u32 %s258_s29, 2 }
  0x3d   : > { %v1877_v47 = vsel %vm292_vm2, %v1156_v45, %v1155_v46  ;;  %s2089_s6 = scalar_lea.vmem %s2159_s3, %s1361_s30 }
  0x3f   : > { %694 = vrot.lane.b32.xlu1 %v1835_v19, %s1655_s21 }
  0x40   : > { %698 = vrot.lane.b32.xlu0 %v1835_v19, %s1654_s12 }
  0x43   : > { %812 = vrot.lane.b32.xlu1 %v1843_v25, %s1655_s21 }
  0x44   : > { %816 = vrot.lane.b32.xlu0 %v1843_v25, %s1654_s12 }
  0x47   : > { %927 = vrot.lane.b32.xlu1 %v1860_v40, %s1655_s21 }
  0x48   : > { %931 = vrot.lane.b32.xlu0 %v1860_v40, %s1654_s12 }
  0x4b   : > { %1045 = vrot.lane.b32.xlu1 %v1866_v43, %s1655_s21 }
  0x4c   : > { %1049 = vrot.lane.b32.xlu0 %v1866_v43, %s1654_s12 }
  0x4f   : > { %1160 = vrot.lane.b32.xlu1 %v1877_v47, %s1655_s21 }
  0x50   : > { %1164 = vrot.lane.b32.xlu0 %v1877_v47, %s1654_s12 }
  0x54   : > { %266 = vperm.xlu0 %1596, %v263_v48  }
  0x9d   : > { %v464_v50 = vpop.permute.xlu1 %463 }
  0x9e   : > { %466 = vst.msk [vmem:[#allocation2 + $0x48] sm:$0xf] %vm295_vm3, %v464_v50  ;;  %v1887_v51 = vpop.permute.xlu0 %341 }
  0x9f   : > { %344 = vst.msk [vmem:[#allocation2 + $0x20] sm:$0xf] %vm295_vm3, %v1887_v51  ;;  %446 = vst.msk [vmem:[#allocation2 + $0x3c] sm:$0xf] %vm295_vm3, %v1887_v51 }
  0xa1   : > { %v318_v52 = vpop.permute.xlu1 %317 }
  0xa2   : > { %320 = vst.msk [vmem:[#allocation2 + $0x10] sm:$0xf] %vm295_vm3, %v318_v52  ;;  %442 = vst.msk [vmem:[#allocation2 + $0x2c] sm:$0xf] %vm295_vm3, %v318_v52  ;;  %v338_v53 = vpop.permute.xlu0 %337 }
  0xa3   : > { %340 = vst.msk [vmem:[#allocation2 + $0x1c] sm:$0xf] %vm295_vm3, %v338_v53  ;;  %445 = vst.msk [vmem:[#allocation2 + $0x38] sm:$0xf] %vm295_vm3, %v338_v53 }
  0xa5   : > { %v460_v54 = vpop.permute.xlu1 %459  ;;  %v471_v55 = vld [vmem:[#allocation2 + $0x48] sm:$0xf] }
  0xa6   : > { %462 = vst.msk [vmem:[#allocation2 + $0x44] sm:$0xf] %vm295_vm3, %v460_v54  ;;  %1442 = vmatpush3.msk.msra.mxu1 %vm354_vm5, %v471_v55  ;;  %v322_v56 = vpop.permute.xlu0 %321  ;;  %v349_v57 = vld [vmem:[#allocation2 + $0x20] sm:$0xf] }
  0xa7   : > { %1443 = vmatprep.subr.mxu1 %v1653_v11  ;;  %324 = vst.msk [vmem:[#allocation2 + $0x14] sm:$0xf] %vm295_vm3, %v322_v56  ;;  %443 = vst.msk [vmem:[#allocation2 + $0x30] sm:$0xf] %vm295_vm3, %v322_v56  ;;  %1429 = vmatpush3.msk.msra.mxu0 %vm354_vm5, %v349_v57 }
  0xa8   : > { %1430 = vmatprep.subr.mxu0 %v1653_v11 }
  0xa9   : > { %v467_v58 = vld [vmem:[#allocation2 + $0x28] sm:$0xff]  ;;  %v298_v59 = vpop.permute.xlu1 %297 }
  0xaa   : > { %677 = vst.msk [vmem:[#allocation2 + $0x2c] sm:$0xf] %vm295_vm3, %v460_v54  ;;  %676 = vst.msk [vmem:[#allocation2 + $0x28] sm:$0xf] %vm295_vm3, %v1762_v28  ;;  %v302_v60 = vpop.permute.xlu0 %301  ;;  %v348_v61 = vld [vmem:[#allocation2 + $0x18] sm:$0xff] }
  0xab   : > { %300 = vst.msk [vmem:[#allocation2 + $0x4] sm:$0xf] %vm295_vm3, %v298_v59  ;;  %304 = vst.msk [vmem:[#allocation2 + $0x8] sm:$0xf] %vm295_vm3, %v302_v60  ;;  %1431 = vmatpush3.msra.mxu0 %v348_v61  ;;  %v469_v62 = vld [vmem:[#allocation2 + $0x38] sm:$0xff] }
  0xac   : > { %578 = vst.msk [vmem:[#allocation2 + $0x18] sm:$0xf] %vm295_vm3, %v1814_v4  ;;  %1432 = vmatprep.subr.mxu0 %v1653_v11 }
  0xad   : > { %v1912_v63 = vpop.permute.xlu1 %579  ;;  %v470_v0 = vld [vmem:[#allocation2 + $0x40] sm:$0xff] }
  0xae   : > { %582 = vst.msk [vmem:[#allocation2 + $0x1c] sm:$0xf] %vm295_vm3, %v1912_v63  ;;  %680 = vst.msk [vmem:[#allocation2 + $0x38] sm:$0xf] %vm295_vm3, %v1912_v63  ;;  %1444 = vmatpush3.msra.mxu1 %v470_v0  ;;  %v347_v1 = vld [vmem:[#allocation2 + $0x10] sm:$0xff]  ;;  %v1920_v3 = vpop.permute.xlu0 %583 }
  0xaf   : > { %693 = vst.msk [vmem:[#allocation2 + $0x40] sm:$0xf] %vm295_vm3, %v1835_v19  ;;  %v468_v2 = vld [vmem:[#allocation2 + $0x30] sm:$0xff]  ;;  %1445 = vmatprep.subr.mxu1 %v1653_v11  ;;  %566 = vst.msk [vmem:[#allocation2 + $0x14] sm:$0xf] %vm295_vm3, %v464_v50  ;;  %1433 = vmatpush3.msra.mxu0 %v347_v1 }
  0xb0   : > { %678 = vst.msk [vmem:[#allocation2 + $0x30] sm:$0xf] %vm295_vm3, %v464_v50  ;;  %679 = vst.msk [vmem:[#allocation2 + $0x34] sm:$0xf] %vm295_vm3, %v1814_v4  ;;  %1446 = vmatpush3.msra.mxu1 %v469_v62  ;;  %1434 = vmatprep.subr.mxu0 %v1653_v11 }
  0xb1   : > { %565 = vst.msk [vmem:[#allocation2 + $0x10] sm:$0xf] %vm295_vm3, %v460_v54  ;;  %586 = vst.msk [vmem:[#allocation2 + $0x20] sm:$0xf] %vm295_vm3, %v1920_v3  ;;  %1447 = vmatprep.subr.mxu1 %v1653_v11  ;;  %v1934_v6 = vld [vmem:[#allocation2 + $0x28] sm:$0xff]  ;;  %v695_v7 = vpop.permute.xlu1 %694 }
  0xb2   : > { %681 = vst.msk [vmem:[#allocation2 + $0x3c] sm:$0xf] %vm295_vm3, %v1920_v3  ;;  %v345_v5 = vld [vmem:[#allocation2] sm:$0xff]  ;;  %1448 = vmatpush3.msra.mxu1 %v468_v2  ;;  %909 = vst.msk [vmem:[#allocation2 + $0x28] sm:$0xf] %vm295_vm3, %v1835_v19  ;;  %v346_v8 = vld [vmem:[#allocation2 + $0x8] sm:$0xff]  ;;  %v699_v9 = vpop.permute.xlu0 %698 }
  0xb3   : > { %562 = vst.msk [vmem:[#allocation2 + $0x4] sm:$0xf] %vm295_vm3, %v338_v53  ;;  %561 = vst.msk [vmem:[#allocation2] sm:$0xf] %vm295_vm3, %v1775_v38  ;;  %1449 = vmatprep.subr.mxu1 %v1653_v11  ;;  %1435 = vmatpush3.msra.mxu0 %v346_v8  ;;  %v1952_v38 = vld [vmem:[%s2157_s1] sm:$0xff] }
  0xb4   : > { %697 = vst.msk [vmem:[#allocation2 + $0x44] sm:$0xf] %vm295_vm3, %v695_v7  ;;  %910 = vst.msk [vmem:[#allocation2 + $0x2c] sm:$0xf] %vm295_vm3, %v695_v7  ;;  %1450 = vmatpush3.msra.mxu1 %v467_v58  ;;  %1436 = vmatprep.subr.mxu0 %v1653_v11 }
  0xb5   : > { %563 = vst.msk [vmem:[#allocation2 + $0x8] sm:$0xf] %vm295_vm3, %v1887_v51  ;;  %564 = vst.msk [vmem:[#allocation2 + $0xc] sm:$0xf] %vm295_vm3, %v1762_v28  ;;  %v590_v10 = vld [vmem:[#allocation2 + $0x18] sm:$0xff]  ;;  %v1955_v12 = vpop.permute.xlu1 %812  ;;  %1452 = vmatmul.mubr.msk.f32.vlgmr.msra.gmra.mxu1 %vm350_vm6, %v1952_v38  ;;  %1437 = vmatpush3.msra.mxu0 %v345_v5 }
  0xb6   : > { %701 = vst.msk [vmem:[#allocation2 + $0x48] sm:$0xf] %vm295_vm3, %v699_v9  ;;  %811 = vst.msk [vmem:[#allocation2 + $0x18] sm:$0xf] %vm295_vm3, %v1843_v25  ;;  %1467 = vmatprep.subr.mxu1 %v1653_v11  ;;  %1454 = vmatprep.subr.mxu0 %v1653_v11  ;;  %v1969_v15 = vpop.permute.xlu0 %816 }
  0xb7   : > { %815 = vst.msk [vmem:[#allocation2 + $0x1c] sm:$0xf] %vm295_vm3, %v1955_v12  ;;  %v1964_v13 = vld [vmem:[#allocation2 + $0x30] sm:$0xff]  ;;  %1439 = vmatmul.mubr.msk.f32.vlgmr.msra.gmra.mxu0 %vm350_vm6, %v1952_v38  ;;  %1477 = vmatprep.mubr.msk.f32.mxu1 %vm1656_vm4, %v1653_v11 }
  0xb8   : > { %v589_v28 = vld [vmem:[#allocation2 + $0x10] sm:$0xff]  ;;  %v591_v14 = vld [vmem:[#allocation2 + $0x20] sm:$0xf]  ;;  %912 = vst.msk [vmem:[#allocation2 + $0x34] sm:$0xf] %vm295_vm3, %v1843_v25  ;;  %1464 = vmatprep.mubr.msk.f32.mxu0 %vm1656_vm4, %v1653_v11 }
  0xb9   : > { %799 = vst.msk [vmem:[#allocation2 + $0x14] sm:$0xf] %vm295_vm3, %v699_v9  ;;  %911 = vst.msk [vmem:[#allocation2 + $0x30] sm:$0xf] %vm295_vm3, %v699_v9  ;;  %1455 = vmatpush3.msk.msra.mxu0 %vm354_vm5, %v591_v14  ;;  %v704_v16 = vld [vmem:[#allocation2 + $0x38] sm:$0xff]  ;;  %v928_v20 = vpop.permute.xlu1 %927 }
  0xba   : > { %798 = vst.msk [vmem:[#allocation2 + $0x10] sm:$0xf] %vm295_vm3, %v695_v7  ;;  %819 = vst.msk [vmem:[#allocation2 + $0x20] sm:$0xf] %vm295_vm3, %v1969_v15  ;;  %v587_v17 = vld [vmem:[#allocation2] sm:$0xff]  ;;  %1456 = vmatprep.subr.mxu0 %v1653_v11  ;;  %v932_v24 = vpop.permute.xlu0 %931 }
  0xbb   : > { %913 = vst.msk [vmem:[#allocation2 + $0x38] sm:$0xf] %vm295_vm3, %v1955_v12  ;;  %914 = vst.msk [vmem:[#allocation2 + $0x3c] sm:$0xf] %vm295_vm3, %v1969_v15  ;;  %v705_v18 = vld [vmem:[#allocation2 + $0x40] sm:$0xff]  ;;  %v1988_v21 = vld [vmem:[#allocation2 + $0x28] sm:$0xff]  ;;  %1457 = vmatpush3.msra.mxu0 %v590_v10 }
  0xbc   : > { %794 = vst.msk [vmem:[#allocation2] sm:$0xf] %vm295_vm3, %v1814_v4  ;;  %795 = vst.msk [vmem:[#allocation2 + $0x4] sm:$0xf] %vm295_vm3, %v1912_v63  ;;  %v588_v22 = vld [vmem:[#allocation2 + $0x8] sm:$0xff]  ;;  %1458 = vmatprep.subr.mxu0 %v1653_v11 }
  0xbd   : > { %926 = vst.msk [vmem:[#allocation2 + $0x40] sm:$0xf] %vm295_vm3, %v1860_v40  ;;  %930 = vst.msk [vmem:[#allocation2 + $0x44] sm:$0xf] %vm295_vm3, %v928_v20  ;;  %v706_v23 = vld [vmem:[#allocation2 + $0x48] sm:$0xf]  ;;  %1459 = vmatpush3.msra.mxu0 %v589_v28  ;;  %v1046_v4 = vpop.permute.xlu1 %1045 }
  0xbe   : > { %1142 = vst.msk [vmem:[#allocation2 + $0x28] sm:$0xf] %vm295_vm3, %v1860_v40  ;;  %1143 = vst.msk [vmem:[#allocation2 + $0x2c] sm:$0xf] %vm295_vm3, %v928_v20  ;;  %1468 = vmatpush3.msk.msra.mxu1 %vm354_vm5, %v706_v23  ;;  %1460 = vmatprep.subr.mxu0 %v1653_v11  ;;  %v823_v26 = vld [vmem:[#allocation2 + $0x18] sm:$0xff]  ;;  %v1050_v27 = vpop.permute.xlu0 %1049 }
  0xbf   : > { %797 = vst.msk [vmem:[#allocation2 + $0xc] sm:$0xf] %vm295_vm3, %v1835_v19  ;;  %796 = vst.msk [vmem:[#allocation2 + $0x8] sm:$0xf] %vm295_vm3, %v1920_v3  ;;  %1469 = vmatprep.subr.mxu1 %v1653_v11  ;;  %1461 = vmatpush3.msra.mxu0 %v588_v22 }
  0xc0   : > { %934 = vst.msk [vmem:[#allocation2 + $0x48] sm:$0xf] %vm295_vm3, %v932_v24  ;;  %1470 = vmatpush3.msra.mxu1 %v705_v18  ;;  %1044 = vst.msk [vmem:[#allocation2 + $0x18] sm:$0xf] %vm295_vm3, %v1866_v43  ;;  %1462 = vmatprep.subr.mxu0 %v1653_v11  ;;  %v936_v30 = vld [vmem:[#allocation2 + $0x30] sm:$0xff] }
  0xc1   : > { %1048 = vst.msk [vmem:[#allocation2 + $0x1c] sm:$0xf] %vm295_vm3, %v1046_v4  ;;  %1471 = vmatprep.subr.mxu1 %v1653_v11  ;;  %v824_v19 = vld [vmem:[#allocation2 + $0x20] sm:$0xf]  ;;  %v822_v29 = vld [vmem:[#allocation2 + $0x10] sm:$0xff]  ;;  %1463 = vmatpush3.msra.mxu0 %v587_v17  ;;  %v1161_v33 = vpop.permute.xlu1 %1160 }
  0xc2   : > { %1472 = vmatpush3.msra.mxu1 %v704_v16  ;;  %1052 = vst.msk [vmem:[#allocation2 + $0x20] sm:$0xf] %vm295_vm3, %v1050_v27  ;;  %1031 = vst.msk [vmem:[#allocation2 + $0x10] sm:$0xf] %vm295_vm3, %v928_v20  ;;  %v937_v31 = vld [vmem:[#allocation2 + $0x38] sm:$0xff]  ;;  %1480 = vmatprep.subr.mxu0 %v1653_v11  ;;  %v1165_v36 = vpop.permute.xlu0 %1164 }
  0xc3   : > { %1032 = vst.msk [vmem:[#allocation2 + $0x14] sm:$0xf] %vm295_vm3, %v932_v24  ;;  %1144 = vst.msk [vmem:[#allocation2 + $0x30] sm:$0xf] %vm295_vm3, %v932_v24  ;;  %1473 = vmatprep.subr.mxu1 %v1653_v11  ;;  %v820_v34 = vld [vmem:[#allocation2] sm:$0xff]  ;;  %1465 = vmatmul.mubr.msk.f32.vlgmr.msra.gmra.mxu0 %vm350_vm6, %v1952_v38 }
  0xc4   : > { %1145 = vst.msk [vmem:[#allocation2 + $0x34] sm:$0xf] %vm295_vm3, %v1866_v43  ;;  %v938_v32 = vld [vmem:[#allocation2 + $0x40] sm:$0xff]  ;;  %1146 = vst.msk [vmem:[#allocation2 + $0x38] sm:$0xf] %vm295_vm3, %v1046_v4  ;;  %1474 = vmatpush3.msra.mxu1 %v1964_v13  ;;  %1481 = vmatpush3.msk.msra.mxu0 %vm354_vm5, %v824_v19 }
  0xc5   : > { %1147 = vst.msk [vmem:[#allocation2 + $0x3c] sm:$0xf] %vm295_vm3, %v1050_v27  ;;  %1159 = vst.msk [vmem:[#allocation2 + $0x40] sm:$0xf] %vm295_vm3, %v1877_v47  ;;  %1475 = vmatprep.subr.mxu1 %v1653_v11  ;;  %1482 = vmatprep.subr.mxu0 %v1653_v11  ;;  %v1168_v47 = vld [vmem:[#allocation2 + $0x28] sm:$0xff] }
  0xc6   : > { %1163 = vst.msk [vmem:[#allocation2 + $0x44] sm:$0xf] %vm295_vm3, %v1161_v33  ;;  %1027 = vst.msk [vmem:[#allocation2] sm:$0xf] %vm295_vm3, %v1843_v25  ;;  %v821_v37 = vld [vmem:[#allocation2 + $0x8] sm:$0xff]  ;;  %1476 = vmatpush3.msra.mxu1 %v1934_v6  ;;  %1483 = vmatpush3.msra.mxu0 %v823_v26 }
  0xc7   : > { %1028 = vst.msk [vmem:[#allocation2 + $0x4] sm:$0xf] %vm295_vm3, %v1955_v12  ;;  %v939_v35 = vld [vmem:[#allocation2 + $0x48] sm:$0xf]  ;;  %1029 = vst.msk [vmem:[#allocation2 + $0x8] sm:$0xf] %vm295_vm3, %v1969_v15  ;;  %1478 = vmatmul.mubr.msk.f32.vlgmr.msra.gmra.mxu1 %vm350_vm6, %v1952_v38  ;;  %1484 = vmatprep.subr.mxu0 %v1653_v11 }
  0xc8   : > { %1167 = vst.msk [vmem:[#allocation2 + $0x48] sm:$0xf] %vm295_vm3, %v1165_v36  ;;  %1030 = vst.msk [vmem:[#allocation2 + $0xc] sm:$0xf] %vm295_vm3, %v1860_v40  ;;  %1493 = vmatprep.subr.mxu1 %v1653_v11  ;;  %1485 = vmatpush3.msra.mxu0 %v822_v29  ;;  %v1056_v39 = vld [vmem:[#allocation2 + $0x18] sm:$0xff] }
  0xc9   : > { %1494 = vmatpush3.msk.msra.mxu1 %vm354_vm5, %v939_v35  ;;  %1486 = vmatprep.subr.mxu0 %v1653_v11  ;;  %v1057_v25 = vld [vmem:[#allocation2 + $0x20] sm:$0xf] }
  0xca   : > { %1495 = vmatprep.subr.mxu1 %v1653_v11  ;;  %1487 = vmatpush3.msra.mxu0 %v821_v37  ;;  %v1055_v41 = vld [vmem:[#allocation2 + $0x10] sm:$0xff] }
  0xcb   : > { %1496 = vmatpush3.msra.mxu1 %v938_v32  ;;  %1488 = vmatprep.subr.mxu0 %v1653_v11  ;;  %v1169_v46 = vld [vmem:[#allocation2 + $0x30] sm:$0xff] }
  0xcc   : > { %1497 = vmatprep.subr.mxu1 %v1653_v11  ;;  %1489 = vmatpush3.msra.mxu0 %v820_v34  ;;  %v1170_v45 = vld [vmem:[#allocation2 + $0x38] sm:$0xff] }
  0xcd   : > { %1490 = vmatprep.mubr.msk.f32.mxu0 %vm1656_vm4, %v1653_v11  ;;  %1498 = vmatpush3.msra.mxu1 %v937_v31  ;;  %v1171_v42 = vld [vmem:[#allocation2 + $0x40] sm:$0xff] }
  0xce   : > { %1491 = vmatmul.mubr.msk.f32.vlgmr.msra.gmra.mxu0 %vm350_vm6, %v1952_v38  ;;  %1499 = vmatprep.subr.mxu1 %v1653_v11  ;;  %v1053_v44 = vld [vmem:[#allocation2] sm:$0xff] }
  0xcf   : > { %1506 = vmatprep.subr.mxu0 %v1653_v11  ;;  %1500 = vmatpush3.msra.mxu1 %v936_v30  ;;  %v1172_v40 = vld [vmem:[#allocation2 + $0x48] sm:$0xf]  ;;  %v267_v48 = vpop.permute.xlu0 %266 }
  0xd0   : > { %1507 = vmatpush3.msk.msra.mxu0 %vm354_vm5, %v1057_v25  ;;  %1501 = vmatprep.subr.mxu1 %v1653_v11  ;;  %v1054_v43 = vld [vmem:[#allocation2 + $0x8] sm:$0xff] }
  0xd1   : > { %1508 = vmatprep.subr.mxu0 %v1653_v11  ;;  %1502 = vmatpush3.msra.mxu1 %v1988_v21 }
  0xd2   : > { %1503 = vmatprep.mubr.msk.f32.mxu1 %vm1656_vm4, %v1653_v11  ;;  %1509 = vmatpush3.msra.mxu0 %v1056_v39 }
  0xd3   : > { %1504 = vmatmul.mubr.msk.f32.vlgmr.msra.gmra.mxu1 %vm350_vm6, %v1952_v38  ;;  %1510 = vmatprep.subr.mxu0 %v1653_v11 }
  0xd4   : > { %1519 = vmatprep.subr.mxu1 %v1653_v11  ;;  %1511 = vmatpush3.msra.mxu0 %v1055_v41 }
  0xd5   : > { %1520 = vmatpush3.msk.msra.mxu1 %vm354_vm5, %v1172_v40  ;;  %1512 = vmatprep.subr.mxu0 %v1653_v11 }
  0xd6   : > { %1521 = vmatprep.subr.mxu1 %v1653_v11  ;;  %1513 = vmatpush3.msra.mxu0 %v1054_v43 }
  0xd7   : > { %1522 = vmatpush3.msra.mxu1 %v1171_v42  ;;  %1514 = vmatprep.subr.mxu0 %v1653_v11 }
  0xd8   : > { %1523 = vmatprep.subr.mxu1 %v1653_v11  ;;  %1515 = vmatpush3.msra.mxu0 %v1053_v44 }
  0xd9   : > { %1516 = vmatprep.mubr.msk.f32.mxu0 %vm1656_vm4, %v1653_v11  ;;  %1524 = vmatpush3.msra.mxu1 %v1170_v45 }
  0xda   : > { %1517 = vmatmul.mubr.msk.f32.vlgmr.msra.gmra.mxu0 %vm350_vm6, %v1952_v38  ;;  %1525 = vmatprep.subr.mxu1 %v1653_v11 }
  0xdb   : > { %1529 = vmatprep.mubr.msk.f32.mxu1 %vm1656_vm4, %v1653_v11  ;;  %1526 = vmatpush3.msra.mxu1 %v1169_v46 }
  0xdc   : > { %1527 = vmatprep.subr.mxu1 %v1653_v11 }
  0xdd   : > { %1528 = vmatpush3.msra.mxu1 %v1168_v47 }
  0xde   : > { %1530 = vmatmul.mubr.msk.f32.vlgmr.msra.gmra.mxu1 %vm350_vm6, %v1952_v38 }
 0x175   : > { %v541_v49 = vpop.f32.mrf.mxu1 }
 0x176   : > { %v542_v50 = vadd.f32 %v541_v49, %v267_v48 }
 0x177   : > { %v424_v11 = vpop.f32.mrf.mxu0  ;;  %v1453_v51 = vpop.f32.mrf.mxu1 }
 0x178   : > { %v425_v52 = vadd.f32 %v424_v11, %v267_v48  ;;  %v551_v53 = vcombine.high %v542_v50, %v542_v50  ;;  %546 = vrot.lane.b32.xlu0 %v542_v50, %s1658_s14 }
 0x179   : > { %v1440_v54 = vpop.f32.mrf.mxu0 }
 0x17a   : > { %428 = vst.msk [vmem:[%s2089_s6] sm:$0xf] %vm295_vm3, %v425_v52  ;;  %v430_v55 = vcombine.high %v425_v52, %v425_v52 }
 0x17c   : > { %431 = vrot.lane.b32.xlu1 %v430_v55, %s1659_s15  ;;  %552 = vrot.lane.b32.xlu0 %v551_v53, %s1660_s7 }
 0x183   : > { %v661_v56 = vpop.f32.mrf.mxu0 }
 0x184   : > { %v662_v57 = vadd.f32 %v661_v56, %v267_v48 }
 0x185   : > { %v1466_v58 = vpop.f32.mrf.mxu0 }
 0x186   : > { %665 = vst.msk [vmem:[%s2089_s6 + $0x4] sm:$0xf] %vm295_vm3, %v662_v57  ;;  %v667_v62 = vcombine.high %v662_v57, %v662_v57 }
 0x187   : > { %v776_v59 = vpop.f32.mrf.mxu1 }
 0x188   : > { %v777_v60 = vadd.f32 %v776_v59, %v267_v48 }
 0x189   : > { %v1479_v61 = vpop.f32.mrf.mxu1 }
 0x18a   : > { %781 = vrot.lane.b32.xlu1 %v777_v60, %s1658_s14  ;;  %v785_v1 = vcombine.high %v777_v60, %v777_v60 }
 0x18e   : > { %v894_v63 = vpop.f32.mrf.mxu0  ;;  %668 = vrot.lane.b32.xlu1 %v667_v62, %s1659_s15 }
 0x18f   : > { %v895_v0 = vadd.f32 %v894_v63, %v267_v48 }
 0x190   : > { %v1492_v2 = vpop.f32.mrf.mxu0 }
 0x191   : > { %898 = vst.msk [vmem:[%s2089_s6 + $0x8] sm:$0xf] %vm295_vm3, %v895_v0  ;;  %v900_v7 = vcombine.high %v895_v0, %v895_v0 }
 0x192   : > { %786 = vrot.lane.b32.xlu1 %v785_v1, %s1660_s7 }
 0x193   : > { %v1009_v3 = vpop.f32.mrf.mxu1 }
 0x194   : > { %v1010_v5 = vadd.f32 %v1009_v3, %v267_v48 }
 0x195   : > { %v1505_v6 = vpop.f32.mrf.mxu1 }
 0x196   : > { %1014 = vrot.lane.b32.xlu0 %v1010_v5, %s1658_s14  ;;  %v1018_v38 = vcombine.high %v1010_v5, %v1010_v5 }
 0x19a   : > { %v1127_v8 = vpop.f32.mrf.mxu0  ;;  %901 = vrot.lane.b32.xlu0 %v900_v7, %s1659_s15 }
 0x19b   : > { %v1128_v9 = vadd.f32 %v1127_v8, %v267_v48 }
 0x19c   : > { %v1518_v10 = vpop.f32.mrf.mxu0 }
 0x19d   : > { %1131 = vst.msk [vmem:[%s2089_s6 + $0xc] sm:$0xf] %vm295_vm3, %v1128_v9  ;;  %v1133_v14 = vcombine.high %v1128_v9, %v1128_v9 }
 0x19e   : > { %1019 = vrot.lane.b32.xlu0 %v1018_v38, %s1660_s7  ;;  %v1242_v12 = vpop.f32.mrf.mxu1 }
 0x19f   : > { %v1243_v28 = vadd.f32 %v1242_v12, %v267_v48 }
 0x1a0   : > { %v1531_v13 = vpop.f32.mrf.mxu1 }
 0x1a1   : > { %1247 = vrot.lane.b32.xlu1 %v1243_v28, %s1658_s14  ;;  %v1251_v15 = vcombine.high %v1243_v28, %v1243_v28 }
 0x1a5   : > { %1134 = vrot.lane.b32.xlu1 %v1133_v14, %s1659_s15 }
 0x1a9   : > { %1252 = vrot.lane.b32.xlu1 %v1251_v15, %s1660_s7 }
 0x1ea   : > { %v547_v16 = vpop.permute.xlu0 %546 }
 0x1ee   : > { %v432_v17 = vpop.permute.xlu1 %431  ;;  %v553_v18 = vpop.permute.xlu0 %552 }
 0x1ef   : > { %435 = vst.msk [vmem:[%s2089_s6] sm:$0xf] %vm434_vm7, %v432_v17 }
 0x1f0   : > { %550 = vst.msk [vmem:[%s2089_s6] sm:$0xf] %vm549_vm8, %v547_v16 }
 0x1f1   : > { %556 = vst.msk [vmem:[%s2089_s6] sm:$0xf] %vm555_vm9, %v553_v18 }
 0x1fc   : > { %v782_v20 = vpop.permute.xlu1 %781 }
 0x200   : > { %v669_v21 = vpop.permute.xlu1 %668 }
 0x201   : > { %671 = vst.msk [vmem:[%s2089_s6 + $0x4] sm:$0xf] %vm434_vm7, %v669_v21 }
 0x202   : > { %784 = vst.msk [vmem:[%s2089_s6 + $0x4] sm:$0xf] %vm549_vm8, %v782_v20 }
 0x204   : > { %v787_v22 = vpop.permute.xlu1 %786 }
 0x205   : > { %789 = vst.msk [vmem:[%s2089_s6 + $0x4] sm:$0xf] %vm555_vm9, %v787_v22 }
 0x208   : > { %v1015_v23 = vpop.permute.xlu0 %1014 }
 0x20c   : > { %v902_v24 = vpop.permute.xlu0 %901 }
 0x20d   : > { %904 = vst.msk [vmem:[%s2089_s6 + $0x8] sm:$0xf] %vm434_vm7, %v902_v24 }
 0x20e   : > { %1017 = vst.msk [vmem:[%s2089_s6 + $0x8] sm:$0xf] %vm549_vm8, %v1015_v23 }
 0x210   : > { %v1020_v4 = vpop.permute.xlu0 %1019 }
 0x211   : > { %1022 = vst.msk [vmem:[%s2089_s6 + $0x8] sm:$0xf] %vm555_vm9, %v1020_v4 }
 0x213   : > { %v1248_v26 = vpop.permute.xlu1 %1247 }
 0x217   : > { %v1135_v19 = vpop.permute.xlu1 %1134 }
 0x218   : > { %1137 = vst.msk [vmem:[%s2089_s6 + $0xc] sm:$0xf] %vm434_vm7, %v1135_v19 }
 0x219   : > { %1250 = vst.msk [vmem:[%s2089_s6 + $0xc] sm:$0xf] %vm549_vm8, %v1248_v26 }
 0x21b   : > { %v1253_v27 = vpop.permute.xlu1 %1252 }
 0x21c   : > { %1255 = vst.msk [vmem:[%s2089_s6 + $0xc] sm:$0xf] %vm555_vm9, %v1253_v27 }
 0x21d PF: > { %s13_s18 = sadd.s32 1, %s1651_s18   ;;  %s2160_s12 = smov %s1631_s13 }
 0x21e   : > { %p10_p12 = scmp.ge.s32.totalorder %s13_s18, 6   ;;  %s2161_s13 = smov %s1732_s25 }
 0x21f   : > { %s2162_s14 = smov %s1643_s16  ;;  %s2163_s15 = smov %s1647_s17 }
 0x220   : > { %s2164_s16 = smov %s2167_s19  ;;  %s2165_s17 = smov %s2171_s20 }
 0x221   :  { %12 = sbr.rel (!%p10_p12) target bundleno = 4 (0x4), region = 106 }

</bundles_post_ra>
